<compile_context>
chip_gen: v5e
topology: v5e:2x2
jax: 0.10.0
libtpu: 0.0.40
codegen_flags: <defaults>
</compile_context>

<pallas_src>
import functools
import math

import jax
import jax.numpy as jnp
from jax import lax
from jax.experimental import pallas as pl
from jax.experimental.pallas import tpu as pltpu


# ---------------------------------------------------------------------------
# Wrapper-side helper (XLA): im2col for the 7x7/s2 stem conv
# ---------------------------------------------------------------------------

def _im2col(x_nhwc, ksize, stride, pad):
    n, h, w, c = x_nhwc.shape
    ho = (h + 2 * pad - ksize) // stride + 1
    wo = (w + 2 * pad - ksize) // stride + 1
    xp = jnp.pad(x_nhwc, ((0, 0), (pad, pad), (pad, pad), (0, 0)))
    cols = []
    for kh in range(ksize):
        for kw in range(ksize):
            cols.append(xp[:, kh:kh + stride * ho:stride,
                           kw:kw + stride * wo:stride, :])
    patches = jnp.concatenate(cols, axis=-1)            # (n, ho, wo, k*k*cin)
    return patches, ho, wo


# ---------------------------------------------------------------------------
# Fully fused kernel: stem conv+BN+ReLU -> maxpool3x3/s2 -> residual block
# ---------------------------------------------------------------------------

def _fused_kernel(p_ref, w1_ref, s1_ref, wa_ref, sa_ref, wb_ref, sb_ref,
                  o_ref, pad_ref, *, h, w):
    c = o_ref.shape[-1]
    hp, wp = h // 2, w // 2          # pooled spatial dims (h, w even)

    # ---- layer1: conv7x7/s2 (BN scale folded into weights) + shift + ReLU ----
    y = jnp.dot(p_ref[0], w1_ref[...], preferred_element_type=jnp.float32)
    y = jnp.maximum(y + s1_ref[...], 0.0)             # (h*w, c), rows = (q, i, jh)
    y = y.reshape(2, h, wp, c)                         # q = column parity, j = 2*jh+q

    # ---- maxpool 3x3 / stride 2 / pad 1 ----------------------------------
    # Padded taps contribute 0, which matches MaxPool2d(padding=1) because
    # every value is >= 0 after the preceding ReLU.
    even_c, odd_c = y[0], y[1]                         # (h, wp, c)
    odd_m1 = jnp.concatenate(                          # odd column j-1 neighbour
        [jnp.zeros((h, 1, c), jnp.float32), odd_c[:, :wp - 1, :]], axis=1)
    colmax = jnp.maximum(jnp.maximum(even_c, odd_c), odd_m1)   # (h, wp, c)
    colmax = colmax.reshape(hp, 2, wp, c)              # split row parity (batch dim)
    even_r, odd_r = colmax[:, 0], colmax[:, 1]         # (hp, wp, c)
    odd_r_m1 = jnp.concatenate(
        [jnp.zeros((1, wp, c), jnp.float32), odd_r[:hp - 1]], axis=0)
    xp = jnp.maximum(jnp.maximum(even_r, odd_r), odd_r_m1)     # (hp, wp, c) f32
    # outer F.relu(layer1(x)) is a no-op: xp >= 0 already.

    # ---- layer2 residual block, entirely resident in VMEM -----------------
    pad_ref[...] = jnp.zeros((hp + 2, wp + 2, c), jnp.float32)

    def conv3x3(w_ref, shift):
        # full in-VMEM im2col -> one (hp*wp, 9c) @ (9c, c) MXU pass (K = 576)
        taps = [pad_ref[kh:kh + hp, kw:kw + wp, :].astype(jnp.bfloat16)
                for kh in range(3) for kw in range(3)]
        lhs = jnp.concatenate(taps, axis=-1).reshape(hp * wp, 9 * c)
        return jnp.dot(lhs, w_ref[...],
                       preferred_element_type=jnp.float32) + shift

    pad_ref[1:hp + 1, 1:wp + 1, :] = xp
    ya = jnp.maximum(conv3x3(wa_ref, sa_ref[...]), 0.0)        # conv_a+BN+ReLU
    pad_ref[1:hp + 1, 1:wp + 1, :] = ya.reshape(hp, wp, c)
    zb = conv3x3(wb_ref, sb_ref[...])                          # conv_b+bias+BN
    o_ref[0] = jnp.maximum(zb + xp.reshape(hp * wp, c), 0.0)   # skip + ReLU


def fused_forward(patches_bf16, w1, s1, wa, sa, wb, sb, h, w):
    n, rows, k1 = patches_bf16.shape
    c = w1.shape[-1]
    hp, wp = h // 2, w // 2
    return pl.pallas_call(
        functools.partial(_fused_kernel, h=h, w=w),
        out_shape=jax.ShapeDtypeStruct((n, hp * wp, c), jnp.float32),
        grid=(n,),
        in_specs=[
            pl.BlockSpec((1, rows, k1), lambda b: (b, 0, 0)),    # stem patches
            pl.BlockSpec((k1, c), lambda b: (0, 0)),             # stem weight
            pl.BlockSpec((1, c), lambda b: (0, 0)),              # stem shift
            pl.BlockSpec((9 * c, c), lambda b: (0, 0)),          # conv2a weight
            pl.BlockSpec((1, c), lambda b: (0, 0)),              # conv2a shift
            pl.BlockSpec((9 * c, c), lambda b: (0, 0)),          # conv2b weight
            pl.BlockSpec((1, c), lambda b: (0, 0)),              # conv2b shift
        ],
        out_specs=pl.BlockSpec((1, hp * wp, c), lambda b: (b, 0, 0)),
        scratch_shapes=[pltpu.VMEM((hp + 2, wp + 2, c), jnp.float32)],
        compiler_params=pltpu.CompilerParams(dimension_semantics=("parallel",)),
    )(patches_bf16, w1, s1, wa, sa, wb, sb)


# ---------------------------------------------------------------------------
# Parameter setup / model wrapper
# ---------------------------------------------------------------------------

class ResNet18ClientPallas:
    """Pallas port of ResNet18_client_side (default active layers: 1 & 2)."""

    CH = 64
    EPS = 1e-5

    def __init__(self, channels, key):
        k1, k2, k3, k4 = jax.random.split(key, 4)
        c = self.CH
        # Conv weights: normal(0, sqrt(2 / (kh*kw*out_channels))), as in __init__.
        self.w1 = (jax.random.normal(k1, (c, channels, 7, 7), jnp.float32)
                   * math.sqrt(2.0 / (7 * 7 * c)))
        self.w2a = (jax.random.normal(k2, (c, c, 3, 3), jnp.float32)
                    * math.sqrt(2.0 / (3 * 3 * c)))
        self.w2b = (jax.random.normal(k3, (c, c, 3, 3), jnp.float32)
                    * math.sqrt(2.0 / (3 * 3 * c)))
        bound = 1.0 / math.sqrt(c * 3 * 3)       # PyTorch default conv-bias init
        self.b2b = jax.random.uniform(k4, (c,), jnp.float32, -bound, bound)

        # BatchNorm2d: weight=1, bias=0 (module __init__), fresh running stats.
        gamma = jnp.ones((c,), jnp.float32)
        beta = jnp.zeros((c,), jnp.float32)
        mean = jnp.zeros((c,), jnp.float32)
        var = jnp.ones((c,), jnp.float32)
        scale = gamma / jnp.sqrt(var + self.EPS)  # identical for all three BNs
        shift = beta - mean * scale

        def hwio(w_oihw):
            return jnp.transpose(w_oihw, (2, 3, 1, 0))

        # Stem: BN scale folded into the (49*cin, cout) im2col weight; bf16 MXU.
        self.w1_mat = (hwio(self.w1).reshape(7 * 7 * channels, c)
                       * scale[None, :]).astype(jnp.bfloat16)
        self.shift1 = shift.reshape(1, c)

        # Residual block: full-im2col (9c, c) weights, BN scale folded, bf16.
        self.w2a_mat = (hwio(self.w2a).reshape(9 * c, c)
                        * scale[None, :]).astype(jnp.bfloat16)
        self.shift2a = shift.reshape(1, c)
        self.w2b_mat = (hwio(self.w2b).reshape(9 * c, c)
                        * scale[None, :]).astype(jnp.bfloat16)
        self.shift2b = (shift + self.b2b * scale).reshape(1, c)

    def __call__(self, x_nchw, volly=None):
        x = jnp.transpose(x_nchw, (0, 2, 3, 1)).astype(jnp.float32)   # -> NHWC
        n = x.shape[0]

        patches, ho, wo = _im2col(x, ksize=7, stride=2, pad=3)
        assert ho % 2 == 0 and wo % 2 == 0, \
            "in-kernel pool parity trick requires even stem-conv output dims"
        hp, wp = ho // 2, wo // 2
        k1 = patches.shape[-1]
        # reorder rows to (column parity, row, pooled column) so the in-kernel
        # stride-2 pool decimation is plain batch-dim slicing.
        p = patches.reshape(n, ho, wp, 2, k1)
        p = jnp.transpose(p, (0, 3, 1, 2, 4)).reshape(n, ho * wo, k1)
        p = p.astype(jnp.bfloat16)

        out = fused_forward(p, self.w1_mat, self.shift1,
                            self.w2a_mat, self.shift2a,
                            self.w2b_mat, self.shift2b, ho, wo)
        out = out.reshape(n, hp, wp, self.CH)
        return jnp.transpose(out, (0, 3, 1, 2)), volly                # -> NCHW


# ---------------------------------------------------------------------------
# Pure-JAX reference for validation
# ---------------------------------------------------------------------------

def reference_forward(x_nchw, m):
    dn = ("NCHW", "OIHW", "NCHW")
    eps = ResNet18ClientPallas.EPS
    c = ResNet18ClientPallas.CH
    ones = jnp.ones((c,), jnp.float32)
    zeros = jnp.zeros((c,), jnp.float32)

    def bn(y, gamma, beta, mean, var):
        sc = gamma / jnp.sqrt(var + eps)
        sh = beta - mean * sc
        return y * sc.reshape(1, -1, 1, 1) + sh.reshape(1, -1, 1, 1)

    y = lax.conv_general_dilated(x_nchw, m.w1, (2, 2), [(3, 3), (3, 3)],
                                 dimension_numbers=dn, precision="highest")
    y = jax.nn.relu(bn(y, ones, zeros, zeros, ones))
    y = lax.reduce_window(y, -jnp.inf, lax.max, (1, 1, 3, 3), (1, 1, 2, 2),
                          [(0, 0), (0, 0), (1, 1), (1, 1)])
    y = jax.nn.relu(y)
    z = lax.conv_general_dilated(y, m.w2a, (1, 1), [(1, 1), (1, 1)],
                                 dimension_numbers=dn, precision="highest")
    z = jax.nn.relu(bn(z, ones, zeros, zeros, ones))
    z = lax.conv_general_dilated(z, m.w2b, (1, 1), [(1, 1), (1, 1)],
                                 dimension_numbers=dn, precision="highest")
    z = z + m.b2b.reshape(1, -1, 1, 1)
    z = bn(z, ones, zeros, zeros, ones)
    return jax.nn.relu(z + y)


# ---------------------------------------------------------------------------

if __name__ == "__main__":
    key = jax.random.PRNGKey(0)
    kx, kp = jax.random.split(key)
    # small input consistent with the module: batch=2, channels=3, 32x32 image
    x = jax.random.normal(kx, (2, 3, 32, 32), jnp.float32)

    model = ResNet18ClientPallas(channels=3, key=kp)
    out, volly = model(x)
    out = jax.block_until_ready(out)

    assert out.shape == (2, 64, 8, 8), out.shape
    assert bool(jnp.all(jnp.isfinite(out)))

    ref = jax.block_until_ready(reference_forward(x, model))
    max_err = float(jnp.max(jnp.abs(out - ref)))
    assert bool(jnp.allclose(out, ref, atol=2e-2, rtol=2e-2)), \
        f"Pallas output does not match JAX reference (max abs err {max_err})"

    print("KERNEL_OK")
</pallas_src>

<mosaic_0001>
module attributes {stable_mosaic.version = 11 : i64} {
  func.func @_fused_kernel(%arg0: i32, %arg1: memref<1x256x147xbf16, #tpu.memory_space<vmem>>, %arg2: memref<147x64xbf16, #tpu.memory_space<vmem>>, %arg3: memref<1x64xf32, #tpu.memory_space<vmem>>, %arg4: memref<576x64xbf16, #tpu.memory_space<vmem>>, %arg5: memref<1x64xf32, #tpu.memory_space<vmem>>, %arg6: memref<576x64xbf16, #tpu.memory_space<vmem>>, %arg7: memref<1x64xf32, #tpu.memory_space<vmem>>, %arg8: memref<1x64x64xf32, #tpu.memory_space<vmem>>, %arg9: memref<10x10x64xf32, #tpu.memory_space<vmem>>) attributes {dimension_semantics = [#tpu.dimension_semantics<parallel>], iteration_bounds = array<i64: 2>, scalar_prefetch = 0 : i64, scratch_operands = 1 : i64, tpu.core_type = #tpu.core_type<tc>, window_params = [{transform_indices = @transform_0, window_bounds = array<i64: 1, 256, 147>}, {pipeline_mode = #tpu.pipeline_mode<synchronous>, transform_indices = @transform_1, window_bounds = array<i64: 147, 64>}, {pipeline_mode = #tpu.pipeline_mode<synchronous>, transform_indices = @transform_2, window_bounds = array<i64: 1, 64>}, {pipeline_mode = #tpu.pipeline_mode<synchronous>, transform_indices = @transform_3, window_bounds = array<i64: 576, 64>}, {pipeline_mode = #tpu.pipeline_mode<synchronous>, transform_indices = @transform_4, window_bounds = array<i64: 1, 64>}, {pipeline_mode = #tpu.pipeline_mode<synchronous>, transform_indices = @transform_5, window_bounds = array<i64: 576, 64>}, {pipeline_mode = #tpu.pipeline_mode<synchronous>, transform_indices = @transform_6, window_bounds = array<i64: 1, 64>}, {transform_indices = @transform_7, window_bounds = array<i64: 1, 64, 64>}]} {
    %c0 = arith.constant 0 : index
    %c0_0 = arith.constant 0 : index
    %c0_1 = arith.constant 0 : index
    %0 = vector.load %arg1[%c0, %c0_0, %c0_1] : memref<1x256x147xbf16, #tpu.memory_space<vmem>>, vector<1x256x147xbf16>
    %1 = vector.shape_cast %0 : vector<1x256x147xbf16> to vector<256x147xbf16>
    %c0_2 = arith.constant 0 : index
    %c0_3 = arith.constant 0 : index
    %2 = vector.load %arg2[%c0_2, %c0_3] : memref<147x64xbf16, #tpu.memory_space<vmem>>, vector<147x64xbf16>
    %cst = arith.constant dense<0.000000e+00> : vector<256x64xf32>
    %3 = tpu.matmul %1, %2, %cst {dimension_numbers = #tpu.dot_dimension_numbers<[1], [0], [0], [1], [0, 0, 1, 1], [], []>} : vector<256x147xbf16>, vector<147x64xbf16>, vector<256x64xf32> -> vector<256x64xf32>
    %c0_4 = arith.constant 0 : index
    %c0_5 = arith.constant 0 : index
    %4 = vector.load %arg3[%c0_4, %c0_5] : memref<1x64xf32, #tpu.memory_space<vmem>>, vector<1x64xf32>
    %5 = vector.broadcast %4 : vector<1x64xf32> to vector<256x64xf32>
    %6 = arith.addf %3, %5 : vector<256x64xf32>
    %cst_6 = arith.constant 0.000000e+00 : f32
    %7 = vector.broadcast %cst_6 : f32 to vector<256x64xf32>
    %8 = arith.maximumf %6, %7 : vector<256x64xf32>
    %9 = vector.shape_cast %8 : vector<256x64xf32> to vector<2x16x8x64xf32>
    %10 = vector.extract_strided_slice %9 {offsets = [0, 0, 0, 0], sizes = [1, 16, 8, 64], strides = [1, 1, 1, 1]} : vector<2x16x8x64xf32> to vector<1x16x8x64xf32>
    %11 = vector.shape_cast %10 : vector<1x16x8x64xf32> to vector<16x8x64xf32>
    %12 = vector.extract_strided_slice %9 {offsets = [1, 0, 0, 0], sizes = [1, 16, 8, 64], strides = [1, 1, 1, 1]} : vector<2x16x8x64xf32> to vector<1x16x8x64xf32>
    %13 = vector.shape_cast %12 : vector<1x16x8x64xf32> to vector<16x8x64xf32>
    %cst_7 = arith.constant 0.000000e+00 : f32
    %14 = vector.broadcast %cst_7 : f32 to vector<16x1x64xf32>
    %15 = vector.extract_strided_slice %13 {offsets = [0, 0, 0], sizes = [16, 7, 64], strides = [1, 1, 1]} : vector<16x8x64xf32> to vector<16x7x64xf32>
    %16 = tpu.concatenate %14, %15 in 1 : vector<16x1x64xf32>, vector<16x7x64xf32> -> vector<16x8x64xf32>
    %17 = arith.maximumf %11, %13 : vector<16x8x64xf32>
    %18 = arith.maximumf %17, %16 : vector<16x8x64xf32>
    %19 = vector.shape_cast %18 : vector<16x8x64xf32> to vector<8x2x8x64xf32>
    %20 = vector.extract_strided_slice %19 {offsets = [0, 0, 0, 0], sizes = [8, 1, 8, 64], strides = [1, 1, 1, 1]} : vector<8x2x8x64xf32> to vector<8x1x8x64xf32>
    %21 = vector.shape_cast %20 : vector<8x1x8x64xf32> to vector<8x8x64xf32>
    %22 = vector.extract_strided_slice %19 {offsets = [0, 1, 0, 0], sizes = [8, 1, 8, 64], strides = [1, 1, 1, 1]} : vector<8x2x8x64xf32> to vector<8x1x8x64xf32>
    %23 = vector.shape_cast %22 : vector<8x1x8x64xf32> to vector<8x8x64xf32>
    %cst_8 = arith.constant 0.000000e+00 : f32
    %24 = vector.broadcast %cst_8 : f32 to vector<1x8x64xf32>
    %25 = vector.extract_strided_slice %23 {offsets = [0, 0, 0], sizes = [7, 8, 64], strides = [1, 1, 1]} : vector<8x8x64xf32> to vector<7x8x64xf32>
    %26 = tpu.concatenate %24, %25 in 0 : vector<1x8x64xf32>, vector<7x8x64xf32> -> vector<8x8x64xf32>
    %27 = arith.maximumf %21, %23 : vector<8x8x64xf32>
    %28 = arith.maximumf %27, %26 : vector<8x8x64xf32>
    %cst_9 = arith.constant 0.000000e+00 : f32
    %29 = vector.broadcast %cst_9 : f32 to vector<10x10x64xf32>
    %c0_10 = arith.constant 0 : index
    %c0_11 = arith.constant 0 : index
    %c0_12 = arith.constant 0 : index
    %30 = vector.load %arg9[%c0_10, %c0_11, %c0_12] : memref<10x10x64xf32, #tpu.memory_space<vmem>>, vector<10x10x64xf32>
    tpu.vector_store %arg9[%c0_10, %c0_11, %c0_12], %29 {strides = array<i32>} : memref<10x10x64xf32, #tpu.memory_space<vmem>>, vector<10x10x64xf32>,
    %c1 = arith.constant 1 : index
    %c1_13 = arith.constant 1 : index
    %c0_14 = arith.constant 0 : index
    %31 = vector.load %arg9[%c1, %c1_13, %c0_14] : memref<10x10x64xf32, #tpu.memory_space<vmem>>, vector<8x8x64xf32>
    tpu.vector_store %arg9[%c1, %c1_13, %c0_14], %28 {strides = array<i32>} : memref<10x10x64xf32, #tpu.memory_space<vmem>>, vector<8x8x64xf32>,
    %c0_15 = arith.constant 0 : index
    %c0_16 = arith.constant 0 : index
    %32 = vector.load %arg5[%c0_15, %c0_16] : memref<1x64xf32, #tpu.memory_space<vmem>>, vector<1x64xf32>
    %c0_17 = arith.constant 0 : index
    %c0_18 = arith.constant 0 : index
    %c0_19 = arith.constant 0 : index
    %33 = vector.load %arg9[%c0_17, %c0_18, %c0_19] : memref<10x10x64xf32, #tpu.memory_space<vmem>>, vector<8x8x64xf32>
    %34 = arith.truncf %33 : vector<8x8x64xf32> to vector<8x8x64xbf16>
    %c0_20 = arith.constant 0 : index
    %c1_21 = arith.constant 1 : index
    %c0_22 = arith.constant 0 : index
    %35 = vector.load %arg9[%c0_20, %c1_21, %c0_22] : memref<10x10x64xf32, #tpu.memory_space<vmem>>, vector<8x8x64xf32>
    %36 = arith.truncf %35 : vector<8x8x64xf32> to vector<8x8x64xbf16>
    %c0_23 = arith.constant 0 : index
    %c2 = arith.constant 2 : index
    %c0_24 = arith.constant 0 : index
    %37 = vector.load %arg9[%c0_23, %c2, %c0_24] : memref<10x10x64xf32, #tpu.memory_space<vmem>>, vector<8x8x64xf32>
    %38 = arith.truncf %37 : vector<8x8x64xf32> to vector<8x8x64xbf16>
    %c1_25 = arith.constant 1 : index
    %c0_26 = arith.constant 0 : index
    %c0_27 = arith.constant 0 : index
    %39 = vector.load %arg9[%c1_25, %c0_26, %c0_27] : memref<10x10x64xf32, #tpu.memory_space<vmem>>, vector<8x8x64xf32>
    %40 = arith.truncf %39 : vector<8x8x64xf32> to vector<8x8x64xbf16>
    %c1_28 = arith.constant 1 : index
    %c1_29 = arith.constant 1 : index
    %c0_30 = arith.constant 0 : index
    %41 = vector.load %arg9[%c1_28, %c1_29, %c0_30] : memref<10x10x64xf32, #tpu.memory_space<vmem>>, vector<8x8x64xf32>
    %42 = arith.truncf %41 : vector<8x8x64xf32> to vector<8x8x64xbf16>
    %c1_31 = arith.constant 1 : index
    %c2_32 = arith.constant 2 : index
    %c0_33 = arith.constant 0 : index
    %43 = vector.load %arg9[%c1_31, %c2_32, %c0_33] : memref<10x10x64xf32, #tpu.memory_space<vmem>>, vector<8x8x64xf32>
    %44 = arith.truncf %43 : vector<8x8x64xf32> to vector<8x8x64xbf16>
    %c2_34 = arith.constant 2 : index
    %c0_35 = arith.constant 0 : index
    %c0_36 = arith.constant 0 : index
    %45 = vector.load %arg9[%c2_34, %c0_35, %c0_36] : memref<10x10x64xf32, #tpu.memory_space<vmem>>, vector<8x8x64xf32>
    %46 = arith.truncf %45 : vector<8x8x64xf32> to vector<8x8x64xbf16>
    %c2_37 = arith.constant 2 : index
    %c1_38 = arith.constant 1 : index
    %c0_39 = arith.constant 0 : index
    %47 = vector.load %arg9[%c2_37, %c1_38, %c0_39] : memref<10x10x64xf32, #tpu.memory_space<vmem>>, vector<8x8x64xf32>
    %48 = arith.truncf %47 : vector<8x8x64xf32> to vector<8x8x64xbf16>
    %c2_40 = arith.constant 2 : index
    %c2_41 = arith.constant 2 : index
    %c0_42 = arith.constant 0 : index
    %49 = vector.load %arg9[%c2_40, %c2_41, %c0_42] : memref<10x10x64xf32, #tpu.memory_space<vmem>>, vector<8x8x64xf32>
    %50 = arith.truncf %49 : vector<8x8x64xf32> to vector<8x8x64xbf16>
    %51 = tpu.concatenate %34, %36, %38, %40, %42, %44, %46, %48, %50 in 2 : vector<8x8x64xbf16>, vector<8x8x64xbf16>, vector<8x8x64xbf16>, vector<8x8x64xbf16>, vector<8x8x64xbf16>, vector<8x8x64xbf16>, vector<8x8x64xbf16>, vector<8x8x64xbf16>, vector<8x8x64xbf16> -> vector<8x8x576xbf16>
    %52 = vector.shape_cast %51 : vector<8x8x576xbf16> to vector<64x576xbf16>
    %c0_43 = arith.constant 0 : index
    %c0_44 = arith.constant 0 : index
    %53 = vector.load %arg4[%c0_43, %c0_44] : memref<576x64xbf16, #tpu.memory_space<vmem>>, vector<576x64xbf16>
    %cst_45 = arith.constant dense<0.000000e+00> : vector<64x64xf32>
    %54 = tpu.matmul %52, %53, %cst_45 {dimension_numbers = #tpu.dot_dimension_numbers<[1], [0], [0], [1], [0, 0, 1, 1], [], []>} : vector<64x576xbf16>, vector<576x64xbf16>, vector<64x64xf32> -> vector<64x64xf32>
    %55 = vector.broadcast %32 : vector<1x64xf32> to vector<64x64xf32>
    %56 = arith.addf %54, %55 : vector<64x64xf32>
    %cst_46 = arith.constant 0.000000e+00 : f32
    %57 = vector.broadcast %cst_46 : f32 to vector<64x64xf32>
    %58 = arith.maximumf %56, %57 : vector<64x64xf32>
    %59 = vector.shape_cast %58 : vector<64x64xf32> to vector<8x8x64xf32>
    %c1_47 = arith.constant 1 : index
    %c1_48 = arith.constant 1 : index
    %c0_49 = arith.constant 0 : index
    %60 = vector.load %arg9[%c1_47, %c1_48, %c0_49] : memref<10x10x64xf32, #tpu.memory_space<vmem>>, vector<8x8x64xf32>
    tpu.vector_store %arg9[%c1_47, %c1_48, %c0_49], %59 {strides = array<i32>} : memref<10x10x64xf32, #tpu.memory_space<vmem>>, vector<8x8x64xf32>,
    %c0_50 = arith.constant 0 : index
    %c0_51 = arith.constant 0 : index
    %61 = vector.load %arg7[%c0_50, %c0_51] : memref<1x64xf32, #tpu.memory_space<vmem>>, vector<1x64xf32>
    %c0_52 = arith.constant 0 : index
    %c0_53 = arith.constant 0 : index
    %c0_54 = arith.constant 0 : index
    %62 = vector.load %arg9[%c0_52, %c0_53, %c0_54] : memref<10x10x64xf32, #tpu.memory_space<vmem>>, vector<8x8x64xf32>
    %63 = arith.truncf %62 : vector<8x8x64xf32> to vector<8x8x64xbf16>
    %c0_55 = arith.constant 0 : index
    %c1_56 = arith.constant 1 : index
    %c0_57 = arith.constant 0 : index
    %64 = vector.load %arg9[%c0_55, %c1_56, %c0_57] : memref<10x10x64xf32, #tpu.memory_space<vmem>>, vector<8x8x64xf32>
    %65 = arith.truncf %64 : vector<8x8x64xf32> to vector<8x8x64xbf16>
    %c0_58 = arith.constant 0 : index
    %c2_59 = arith.constant 2 : index
    %c0_60 = arith.constant 0 : index
    %66 = vector.load %arg9[%c0_58, %c2_59, %c0_60] : memref<10x10x64xf32, #tpu.memory_space<vmem>>, vector<8x8x64xf32>
    %67 = arith.truncf %66 : vector<8x8x64xf32> to vector<8x8x64xbf16>
    %c1_61 = arith.constant 1 : index
    %c0_62 = arith.constant 0 : index
    %c0_63 = arith.constant 0 : index
    %68 = vector.load %arg9[%c1_61, %c0_62, %c0_63] : memref<10x10x64xf32, #tpu.memory_space<vmem>>, vector<8x8x64xf32>
    %69 = arith.truncf %68 : vector<8x8x64xf32> to vector<8x8x64xbf16>
    %c1_64 = arith.constant 1 : index
    %c1_65 = arith.constant 1 : index
    %c0_66 = arith.constant 0 : index
    %70 = vector.load %arg9[%c1_64, %c1_65, %c0_66] : memref<10x10x64xf32, #tpu.memory_space<vmem>>, vector<8x8x64xf32>
    %71 = arith.truncf %70 : vector<8x8x64xf32> to vector<8x8x64xbf16>
    %c1_67 = arith.constant 1 : index
    %c2_68 = arith.constant 2 : index
    %c0_69 = arith.constant 0 : index
    %72 = vector.load %arg9[%c1_67, %c2_68, %c0_69] : memref<10x10x64xf32, #tpu.memory_space<vmem>>, vector<8x8x64xf32>
    %73 = arith.truncf %72 : vector<8x8x64xf32> to vector<8x8x64xbf16>
    %c2_70 = arith.constant 2 : index
    %c0_71 = arith.constant 0 : index
    %c0_72 = arith.constant 0 : index
    %74 = vector.load %arg9[%c2_70, %c0_71, %c0_72] : memref<10x10x64xf32, #tpu.memory_space<vmem>>, vector<8x8x64xf32>
    %75 = arith.truncf %74 : vector<8x8x64xf32> to vector<8x8x64xbf16>
    %c2_73 = arith.constant 2 : index
    %c1_74 = arith.constant 1 : index
    %c0_75 = arith.constant 0 : index
    %76 = vector.load %arg9[%c2_73, %c1_74, %c0_75] : memref<10x10x64xf32, #tpu.memory_space<vmem>>, vector<8x8x64xf32>
    %77 = arith.truncf %76 : vector<8x8x64xf32> to vector<8x8x64xbf16>
    %c2_76 = arith.constant 2 : index
    %c2_77 = arith.constant 2 : index
    %c0_78 = arith.constant 0 : index
    %78 = vector.load %arg9[%c2_76, %c2_77, %c0_78] : memref<10x10x64xf32, #tpu.memory_space<vmem>>, vector<8x8x64xf32>
    %79 = arith.truncf %78 : vector<8x8x64xf32> to vector<8x8x64xbf16>
    %80 = tpu.concatenate %63, %65, %67, %69, %71, %73, %75, %77, %79 in 2 : vector<8x8x64xbf16>, vector<8x8x64xbf16>, vector<8x8x64xbf16>, vector<8x8x64xbf16>, vector<8x8x64xbf16>, vector<8x8x64xbf16>, vector<8x8x64xbf16>, vector<8x8x64xbf16>, vector<8x8x64xbf16> -> vector<8x8x576xbf16>
    %81 = vector.shape_cast %80 : vector<8x8x576xbf16> to vector<64x576xbf16>
    %c0_79 = arith.constant 0 : index
    %c0_80 = arith.constant 0 : index
    %82 = vector.load %arg6[%c0_79, %c0_80] : memref<576x64xbf16, #tpu.memory_space<vmem>>, vector<576x64xbf16>
    %cst_81 = arith.constant dense<0.000000e+00> : vector<64x64xf32>
    %83 = tpu.matmul %81, %82, %cst_81 {dimension_numbers = #tpu.dot_dimension_numbers<[1], [0], [0], [1], [0, 0, 1, 1], [], []>} : vector<64x576xbf16>, vector<576x64xbf16>, vector<64x64xf32> -> vector<64x64xf32>
    %84 = vector.broadcast %61 : vector<1x64xf32> to vector<64x64xf32>
    %85 = arith.addf %83, %84 : vector<64x64xf32>
    %86 = vector.shape_cast %28 : vector<8x8x64xf32> to vector<64x64xf32>
    %87 = arith.addf %85, %86 : vector<64x64xf32>
    %cst_82 = arith.constant 0.000000e+00 : f32
    %88 = vector.broadcast %cst_82 : f32 to vector<64x64xf32>
    %89 = arith.maximumf %87, %88 : vector<64x64xf32>
    %c0_83 = arith.constant 0 : index
    %c0_84 = arith.constant 0 : index
    %c0_85 = arith.constant 0 : index
    %90 = vector.load %arg8[%c0_83, %c0_84, %c0_85] : memref<1x64x64xf32, #tpu.memory_space<vmem>>, vector<1x64x64xf32>
    %91 = vector.shape_cast %90 : vector<1x64x64xf32> to vector<64x64xf32>
    %92 = vector.shape_cast %89 : vector<64x64xf32> to vector<1x64x64xf32>
    tpu.vector_store %arg8[%c0_83, %c0_84, %c0_85], %92 {strides = array<i32>} : memref<1x64x64xf32, #tpu.memory_space<vmem>>, vector<1x64x64xf32>,
    return
  }
  func.func @transform_0(%arg0: i32) -> (i32, i32, i32) {
    %c0_i32 = arith.constant 0 : i32
    %c0_i32_0 = arith.constant 0 : i32
    %c0_i32_1 = arith.constant 0 : i32
    return %arg0, %c0_i32, %c0_i32_0 : i32, i32, i32
  }
  func.func @transform_1(%arg0: i32) -> (i32, i32) {
    %c0_i32 = arith.constant 0 : i32
    %c0_i32_0 = arith.constant 0 : i32
    %c0_i32_1 = arith.constant 0 : i32
    return %c0_i32, %c0_i32_0 : i32, i32
  }
  func.func @transform_2(%arg0: i32) -> (i32, i32) {
    %c0_i32 = arith.constant 0 : i32
    %c0_i32_0 = arith.constant 0 : i32
    %c0_i32_1 = arith.constant 0 : i32
    return %c0_i32, %c0_i32_0 : i32, i32
  }
  func.func @transform_3(%arg0: i32) -> (i32, i32) {
    %c0_i32 = arith.constant 0 : i32
    %c0_i32_0 = arith.constant 0 : i32
    %c0_i32_1 = arith.constant 0 : i32
    return %c0_i32, %c0_i32_0 : i32, i32
  }
  func.func @transform_4(%arg0: i32) -> (i32, i32) {
    %c0_i32 = arith.constant 0 : i32
    %c0_i32_0 = arith.constant 0 : i32
    %c0_i32_1 = arith.constant 0 : i32
    return %c0_i32, %c0_i32_0 : i32, i32
  }
  func.func @transform_5(%arg0: i32) -> (i32, i32) {
    %c0_i32 = arith.constant 0 : i32
    %c0_i32_0 = arith.constant 0 : i32
    %c0_i32_1 = arith.constant 0 : i32
    return %c0_i32, %c0_i32_0 : i32, i32
  }
  func.func @transform_6(%arg0: i32) -> (i32, i32) {
    %c0_i32 = arith.constant 0 : i32
    %c0_i32_0 = arith.constant 0 : i32
    %c0_i32_1 = arith.constant 0 : i32
    return %c0_i32, %c0_i32_0 : i32, i32
  }
  func.func @transform_7(%arg0: i32) -> (i32, i32, i32) {
    %c0_i32 = arith.constant 0 : i32
    %c0_i32_0 = arith.constant 0 : i32
    %c0_i32_1 = arith.constant 0 : i32
    return %arg0, %c0_i32, %c0_i32_0 : i32, i32, i32
  }
}

</mosaic_0001>

<bundles_post_ra>
// kernel: tpu_custom_call.1
= control target key start
LH: loop header
LB: loop body
LE: loop exit
PB: predicated region body
PF: predicated region fallthrough
CT: control target
= control target key end

     0   :  { %12 = vsyncpa [#allocation4], 0  ;;  %s4930_s0 = inlined_call_operand.vmem [shape: bf16[2,256,147], index: 0, kind: input, shape index: {}]   ;;  %s4931_s1 = inlined_call_operand.vmem [shape: bf16[147,64], index: 1, kind: input, shape index: {}]   ;;  %s4932_s2 = inlined_call_operand.vmem [shape: f32[1,64], index: 2, kind: input, shape index: {}]   ;;  %s4933_s3 = inlined_call_operand.vmem [shape: bf16[576,64], index: 3, kind: input, shape index: {}]   ;;  %s4934_s4 = inlined_call_operand.vmem [shape: f32[1,64], index: 4, kind: input, shape index: {}]   ;;  %s4935_s5 = inlined_call_operand.vmem [shape: bf16[576,64], index: 5, kind: input, shape index: {}]   ;;  %s4936_s6 = inlined_call_operand.vmem [shape: f32[1,64], index: 6, kind: input, shape index: {}]   ;;  %s4937_s7 = inlined_call_operand.hbm [shape: f32[2,64,64], index: 7, kind: output, shape index: {}]  }
   0x1   :  { %14 = vsyncpa [#allocation4 + $0x1], 0  ;;  %s3759_s24 = smov 0   ;;  %s3761_s25 = smov 0  }
   0x2   :  { %s3763_s26 = smov 0   ;;  %s3765_s27 = smov 0  }
   0x3 LB: > { %s3780_s28 = sadd.s32 4294967295, %s3712_s27   ;;  %s2992_s29 = sadd.s32 4294967294, %s3712_s27   ;;  %s3712_s27 = sphi %s3765_s27, %s4943_s27   ;;  %s3708_s26 = sphi %s3763_s26, %s4942_s26   ;;  %s3704_s25 = sphi %s3761_s25, %s4941_s25   ;;  %s3700_s24 = sphi %s3759_s24, %s4940_s24  }
   0x4   : > { %s3784_s30 = sadd.s32 1, %s3712_s27   ;;  %s179_s8 = sadd.s32 1, %s3708_s26 }
   0x5   : > { %s176_s9 = ssub.s32 %s3712_s27, %s3784_s30  ;;  %p189_p0 = scmp.ne.s32.totalorder %s3708_s26, %s3704_s25 }
   0x6   : > { %p177_p1 = scmp.eq.s32.totalorder %s176_s9, 0  ;;  %p190_p2 = scmp.eq.s32.totalorder %s3780_s28, 1 }
   0x7   : > { %p195_p3 = scmp.ne.s32.totalorder %s3704_s25, %s3700_s24  ;;  %p196_p4 = scmp.eq.s32.totalorder %s2992_s29, 1 }
   0x8   : > { %s3795_s10 = scalar_select %p177_p1, %s3708_s26, %s179_s8  }
   0x9   : > { %p3797_p5 = por %p190_p2, %p189_p0  ;;  %p3801_p6 = por %p196_p4, %p195_p3 }
   0xa   : > { %p2995_p7 = scmp.ge.s32.totalorder %s3712_s27, 1  ;;  %p240_p8 = scmp.lt.s32.totalorder %s3712_s27, 3 }
   0xc   : > { %p241_p9 = pnand %p2995_p7, %p240_p8 }
   0xd   : > { %p272_p10 = scmp.lt.s32.totalorder (!%p241_p9), %s3780_s28, 1  ;;  %s269_s17 = sand.u32 (!%p241_p9), 1, %s3704_s25  }
   0xe   : > { %244 = sbr.rel (%p241_p9) target bundleno = 1160 (0x488), region = 48  ;;  %s3670_s16 = scalar_lea.hbm (!%p241_p9), %s4937_s7, 128 }
  0x13   : > { %v3520_v0 = vld [vmem:[%s4931_s1 + $0x38] sm:$0xff]  ;;  %v328_v1 = vld [vmem:[%s4931_s1 + $0x48] sm:$0x3]  ;;  %vm583_vm0 = vcmask 1040384   ;;  %vm584_vm1 = vcmask 1041408   ;;  %v3519_v3 = vld [vmem:[%s4931_s1 + $0x30] sm:$0xff] }
  0x14   : > { %v514_v2 = vunpack.c.l.b16 %v328_v1  ;;  %590 = vmatpush.bf16.msra.mxu0 %v3520_v0  ;;  %v3714_v4 = vmov 65535   ;;  %3595 = vmatpush.bf16.msra.mxu2 %v3520_v0  ;;  %s273_s19 = scalar_select %p272_p10, %s3780_s28, 1  ;;  %v3518_v9 = vld [vmem:[%s4931_s1 + $0x28] sm:$0xff]  ;;  %v3521_v10 = vld [vmem:[%s4931_s1 + $0x40] sm:$0xff]  ;;  %vm534_vm2 = vcmask 154624   ;;  %v3516_v15 = vld [vmem:[%s4931_s1 + $0x18] sm:$0xff] }
  0x15   : > { %v585_v5 = vsel %vm583_vm0, 4294967295, %v3714_v4  ;;  %v3517_v14 = vld [vmem:[%s4931_s1 + $0x20] sm:$0xff]  ;;  %v3515_v16 = vld [vmem:[%s4931_s1 + $0x10] sm:$0xff]  ;;  %v3514_v17 = vld [vmem:[%s4931_s1 + $0x8] sm:$0xff]  ;;  %vm912_vm3 = vcmask 523264   ;;  %vm914_vm4 = vcmask 517120  }
  0x16   : > { %v524_v6 = vpack.c.b16 %v514_v2, %v514_v2  ;;  %v586_v7 = vsel %vm584_vm1, %v585_v5, 0  ;;  %s3480_s20 = sshll.u32 %s273_s19, 8  ;;  %v3513_v21 = vld [vmem:[%s4931_s1] sm:$0xff]  ;;  %s3594_s19 = sshll.u32 %s3780_s28, 6 }
  0x17   : > { %s3825_s8 = scalar_lea.vmem %s4930_s0, %s3480_s20  ;;  %s2926_s22 = scalar_lea.hbm %s4937_s7, %s3594_s19 }
  0x18   : > { %v588_v8 = vand.u32 %v586_v7, %v524_v6  ;;  %591 = vmatpush.bf16.msra.mxu0 %v3519_v3  ;;  %3596 = vmatpush.bf16.msra.mxu2 %v3519_v3  ;;  %v3481_v11 = vld [vmem:[%s3825_s8 + $0x4] sm:$0xf]  ;;  %v3003_v12 = vld [vmem:[%s3825_s8 + $0x8] sm:$0xf0]  ;;  %v3483_v18 = vld [vmem:[%s3825_s8 + $0x14] sm:$0xf] }
  0x19   : > { %v3006_v13 = vor.u32 %v3481_v11, %v3003_v12  ;;  %v3011_v19 = vld [vmem:[%s3825_s8 + $0x18] sm:$0xf0]  ;;  %v3001_v22 = vld [vmem:[%s3825_s8] sm:$0xf]  ;;  %v3482_v23 = vld [vmem:[%s3825_s8 + $0x4] sm:$0xf0] }
  0x1a   : > { %685 = vmatpush.bf16.msra.mxu1 %v588_v8  ;;  %v3014_v20 = vor.u32 %v3483_v18, %v3011_v19  ;;  %v3002_v24 = vor.u32 %v3482_v23, %v3001_v22  ;;  %v3485_v25 = vld [vmem:[%s3825_s8 + $0x24] sm:$0xf]  ;;  %v3019_v26 = vld [vmem:[%s3825_s8 + $0x28] sm:$0xf0]  ;;  %v3009_v28 = vld [vmem:[%s3825_s8 + $0x10] sm:$0xf] }
  0x1b   : > { %v3022_v27 = vor.u32 %v3485_v25, %v3019_v26  ;;  %v3484_v29 = vld [vmem:[%s3825_s8 + $0x14] sm:$0xf0]  ;;  %v3487_v31 = vld [vmem:[%s3825_s8 + $0x34] sm:$0xf]  ;;  %v3027_v32 = vld [vmem:[%s3825_s8 + $0x38] sm:$0xf0] }
  0x1c   : > { %592 = vmatpush.bf16.msra.mxu0 %v3518_v9  ;;  %3597 = vmatpush.bf16.msra.mxu2 %v3518_v9  ;;  %v3010_v30 = vor.u32 %v3484_v29, %v3009_v28  ;;  %v3030_v33 = vor.u32 %v3487_v31, %v3027_v32  ;;  %v3017_v34 = vld [vmem:[%s3825_s8 + $0x20] sm:$0xf]  ;;  %v3486_v35 = vld [vmem:[%s3825_s8 + $0x24] sm:$0xf0]  ;;  %v3489_v37 = vld [vmem:[%s3825_s8 + $0x44] sm:$0xf] }
  0x1d   : > { %v3018_v36 = vor.u32 %v3486_v35, %v3017_v34  ;;  %v3035_v38 = vld [vmem:[%s3825_s8 + $0x48] sm:$0xf0]  ;;  %v3025_v40 = vld [vmem:[%s3825_s8 + $0x30] sm:$0xf]  ;;  %v3488_v41 = vld [vmem:[%s3825_s8 + $0x34] sm:$0xf0] }
  0x1e   : > { %686 = vmatpush.bf16.msra.mxu1 %v3521_v10  ;;  %v3038_v39 = vor.u32 %v3489_v37, %v3035_v38  ;;  %v3026_v42 = vor.u32 %v3488_v41, %v3025_v40  ;;  %v3491_v43 = vld [vmem:[%s3825_s8 + $0x54] sm:$0xf]  ;;  %v3043_v44 = vld [vmem:[%s3825_s8 + $0x58] sm:$0xf0]  ;;  %v3033_v46 = vld [vmem:[%s3825_s8 + $0x40] sm:$0xf] }
  0x1f   : > { %v3046_v45 = vor.u32 %v3491_v43, %v3043_v44  ;;  %v3490_v47 = vld [vmem:[%s3825_s8 + $0x44] sm:$0xf0]  ;;  %v3493_v49 = vld [vmem:[%s3825_s8 + $0x64] sm:$0xf]  ;;  %v3051_v50 = vld [vmem:[%s3825_s8 + $0x68] sm:$0xf0] }
  0x20   : > { %593 = vmatpush.bf16.msra.mxu0 %v3517_v14  ;;  %3598 = vmatpush.bf16.msra.mxu2 %v3517_v14  ;;  %v3034_v48 = vor.u32 %v3490_v47, %v3033_v46  ;;  %v3054_v51 = vor.u32 %v3493_v49, %v3051_v50  ;;  %v3041_v52 = vld [vmem:[%s3825_s8 + $0x50] sm:$0xf]  ;;  %v3492_v53 = vld [vmem:[%s3825_s8 + $0x54] sm:$0xf0]  ;;  %v3495_v55 = vld [vmem:[%s3825_s8 + $0x74] sm:$0xf] }
  0x21   : > { %3163 = vmatmul.msk.bf16.vlgmr.msra.gmra.mxu1 %vm534_vm2, %v3006_v13  ;;  %v3042_v54 = vor.u32 %v3492_v53, %v3041_v52  ;;  %v3059_v56 = vld [vmem:[%s3825_s8 + $0x78] sm:$0xf0]  ;;  %v3049_v58 = vld [vmem:[%s3825_s8 + $0x60] sm:$0xf]  ;;  %v3494_v59 = vld [vmem:[%s3825_s8 + $0x64] sm:$0xf0] }
  0x22   : > { %v3062_v57 = vor.u32 %v3495_v55, %v3059_v56  ;;  %v3050_v60 = vor.u32 %v3494_v59, %v3049_v58  ;;  %v3497_v61 = vld [vmem:[%s3825_s8 + $0x84] sm:$0xf]  ;;  %v3067_v62 = vld [vmem:[%s3825_s8 + $0x88] sm:$0xf0]  ;;  %v3057_v0 = vld [vmem:[%s3825_s8 + $0x70] sm:$0xf] }
  0x23   : > { %v3070_v63 = vor.u32 %v3497_v61, %v3067_v62  ;;  %v3496_v1 = vld [vmem:[%s3825_s8 + $0x74] sm:$0xf0]  ;;  %v3499_v5 = vld [vmem:[%s3825_s8 + $0x94] sm:$0xf]  ;;  %v3075_v6 = vld [vmem:[%s3825_s8 + $0x98] sm:$0xf0] }
  0x24   : > { %594 = vmatpush.bf16.msra.mxu0 %v3516_v15  ;;  %3599 = vmatpush.bf16.msra.mxu2 %v3516_v15  ;;  %v3058_v3 = vor.u32 %v3496_v1, %v3057_v0  ;;  %v3078_v7 = vor.u32 %v3499_v5, %v3075_v6  ;;  %v3065_v8 = vld [vmem:[%s3825_s8 + $0x80] sm:$0xf]  ;;  %v3498_v9 = vld [vmem:[%s3825_s8 + $0x84] sm:$0xf0]  ;;  %v3501_v19 = vld [vmem:[%s3825_s8 + $0xa4] sm:$0xf] }
  0x25   : > { %v3895_v11 = vld [vmem:[%s4932_s2] ss:$0 sm:$0xff]  ;;  %v3066_v12 = vor.u32 %v3498_v9, %v3065_v8  ;;  %v3073_v23 = vld [vmem:[%s3825_s8 + $0x90] sm:$0xf]  ;;  %v3091_v34 = vld [vmem:[%s3825_s8 + $0xb8] sm:$0xf0] }
  0x26   : > { %v3081_v37 = vld [vmem:[%s3825_s8 + $0xa0] sm:$0xf]  ;;  %v3502_v38 = vld [vmem:[%s3825_s8 + $0xa4] sm:$0xf0]  ;;  %v3505_v49 = vld [vmem:[%s3825_s8 + $0xc4] sm:$0xf] }
  0x27   : > { %v3082_v40 = vor.u32 %v3502_v38, %v3081_v37  ;;  %v3113_v43 = vld [vmem:[%s3825_s8 + $0xe0] sm:$0xf]  ;;  %v3510_v44 = vld [vmem:[%s3825_s8 + $0xe4] sm:$0xf0]  ;;  %v3099_v50 = vld [vmem:[%s3825_s8 + $0xc8] sm:$0xf0] }
  0x28   : > { %595 = vmatpush.bf16.msra.mxu0 %v3515_v16  ;;  %3600 = vmatpush.bf16.msra.mxu2 %v3515_v16  ;;  %v3114_v46 = vor.u32 %v3510_v44, %v3113_v43  ;;  %v3089_v52 = vld [vmem:[%s3825_s8 + $0xb0] sm:$0xf]  ;;  %v3504_v53 = vld [vmem:[%s3825_s8 + $0xb4] sm:$0xf0]  ;;  %v3507_v0 = vld [vmem:[%s3825_s8 + $0xd4] sm:$0xf] }
  0x29   : > { %v3090_v55 = vor.u32 %v3504_v53, %v3089_v52  ;;  %v3512_v61 = vld [vmem:[%s3825_s8 + $0xf4] sm:$0xf0]  ;;  %v3107_v1 = vld [vmem:[%s3825_s8 + $0xd8] sm:$0xf0]  ;;  %s2929_s29 = sshll.u32 %s2926_s22, 4  ;;  %s2915_s28 = scalar_lea.sflag [#allocation4], %s269_s17  ;;  %s2930_s29 = int_to_ptr.hbm [resolvable:$true] %s2929_s29 }
  0x2a   : > { %s3664_s9 = sshra.s32 %s2930_s29, 4  ;;  %s3665_s9 = int_to_ptr.hbm [resolvable:$true] %s3664_s9 }
  0x2b   : > { %s3666_s13 = scalar_lea.hbm %s3665_s9, 64  ;;  %p3671_p0 = scmp.lt.s32.totalorder %s3665_s9, %s4937_s7 }
  0x2c   : > { %596 = vmatpush.bf16.msra.mxu0 %v3514_v17  ;;  %3601 = vmatpush.bf16.msra.mxu2 %v3514_v17  ;;  %p3667_p11 = scmp.ne.s32.totalorder %s3665_s9, %s3666_s13  ;;  %p3672_p1 = scmp.lt.s32.totalorder %s3670_s16, %s3666_s13 }
  0x2e   : > { %p3668_p12 = pnand %p3667_p11, %p3797_p5  ;;  %p3673_p2 = por %p3672_p1, %p3671_p0 }
  0x30   : > { %597 = vmatpush.bf16.msra.mxu0 %v3513_v21  ;;  %3602 = vmatpush.bf16.msra.mxu2 %v3513_v21  ;;  %p3669_p13 = pneg %p3668_p12 }
  0x31   : > { %3164 = vmatmul.msk.bf16.gmra.mxu1 %vm534_vm2, %v3014_v20  ;;  %v3083_v20 = vld [vmem:[%s3825_s8 + $0xa8] sm:$0xf0] }
  0x32   : > { %v3086_v22 = vor.u32 %v3501_v19, %v3083_v20  ;;  %p3674_p3 = pnand %p3673_p2, %p3669_p13 }
  0x33   : > { %598 = vmatmul.bf16.vlgmr.msra.gmra.mxu0 %v3002_v24  ;;  %v3500_v24 = vld [vmem:[%s3825_s8 + $0x94] sm:$0xf0]  ;;  %668 = vmatmul.bf16.vlgmr.msra.gmra.mxu2 %v3114_v46 }
  0x34   : > { %v3074_v26 = vor.u32 %v3500_v24, %v3073_v23 }
  0x41   : > { %3165 = vmatmul.msk.bf16.gmra.mxu1 %vm534_vm2, %v3022_v27 }
  0x43   : > { %603 = vmatmul.bf16.gmra.mxu0 %v3010_v30 }
  0x51   : > { %3166 = vmatmul.msk.bf16.gmra.mxu1 %vm534_vm2, %v3030_v33  ;;  %v3503_v33 = vld [vmem:[%s3825_s8 + $0xb4] sm:$0xf] }
  0x53   : > { %608 = vmatmul.bf16.gmra.mxu0 %v3018_v36  ;;  %v3094_v36 = vor.u32 %v3503_v33, %v3091_v34 }
  0x61   : > { %3167 = vmatmul.msk.bf16.gmra.mxu1 %vm534_vm2, %v3038_v39 }
  0x63   : > { %613 = vmatmul.bf16.gmra.mxu0 %v3026_v42 }
  0x71   : > { %3168 = vmatmul.msk.bf16.gmra.mxu1 %vm534_vm2, %v3046_v45 }
  0x73   : > { %618 = vmatmul.bf16.gmra.mxu0 %v3034_v48 }
  0x81   : > { %3169 = vmatmul.msk.bf16.gmra.mxu1 %vm534_vm2, %v3054_v51  ;;  %v3102_v51 = vor.u32 %v3505_v49, %v3099_v50 }
  0x83   : > { %623 = vmatmul.bf16.gmra.mxu0 %v3042_v54 }
  0x91   : > { %3170 = vmatmul.msk.bf16.gmra.mxu1 %vm534_vm2, %v3062_v57 }
  0x93   : > { %628 = vmatmul.bf16.gmra.mxu0 %v3050_v60  ;;  %v3121_v60 = vld [vmem:[%s3825_s8 + $0xf0] sm:$0xf] }
  0x94   : > { %v3122_v62 = vor.u32 %v3512_v61, %v3121_v60 }
  0x96   : > { %673 = vmatmul.bf16.gmra.mxu2 %v3122_v62 }
  0x9e   : > { %v688_v2 = vpop.f32.mrf.mxu1 }
  0xa1   : > { %3171 = vmatmul.msk.bf16.gmra.mxu1 %vm534_vm2, %v3070_v63 }
  0xa3   : > { %633 = vmatmul.bf16.gmra.mxu0 %v3058_v3  ;;  %v3097_v3 = vld [vmem:[%s3825_s8 + $0xc0] sm:$0xf] }
  0xa6   : > { %v690_v4 = vpop.f32.mrf.mxu1 }
  0xae   : > { %v693_v10 = vpop.f32.mrf.mxu1 }
  0xb0   : > { %v599_v13 = vpop.f32.mrf.mxu0 }
  0xb1   : > { %3172 = vmatmul.msk.bf16.gmra.mxu1 %vm534_vm2, %v3078_v7  ;;  %v600_v14 = vadd.f32 %v3895_v11, %v599_v13  ;;  %v3509_v13 = vld [vmem:[%s3825_s8 + $0xe4] sm:$0xf] }
  0xb3   : > { %v3899_v15 = vadd.f32 %v688_v2, %v600_v14  ;;  %638 = vmatmul.bf16.gmra.mxu0 %v3066_v12  ;;  %v3110_v2 = vor.u32 %v3507_v0, %v3107_v1  ;;  %v3115_v14 = vld [vmem:[%s3825_s8 + $0xe8] sm:$0xf0] }
  0xb6   : > { %v695_v16 = vpop.f32.mrf.mxu1 }
  0xb8   : > { %v601_v17 = vpop.f32.mrf.mxu0 }
  0xb9   : > { %v602_v18 = vadd.f32 %v3895_v11, %v601_v17  ;;  %v3105_v17 = vld [vmem:[%s3825_s8 + $0xd0] sm:$0xf] }
  0xbb   : > { %v3904_v21 = vadd.f32 %v690_v4, %v602_v18  ;;  %v3506_v4 = vld [vmem:[%s3825_s8 + $0xc4] sm:$0xf0]  ;;  %v3508_v18 = vld [vmem:[%s3825_s8 + $0xd4] sm:$0xf0] }
  0xbc   : > { %v3098_v6 = vor.u32 %v3506_v4, %v3097_v3  ;;  %v3106_v20 = vor.u32 %v3508_v18, %v3105_v17 }
  0xbd   : > { %v769_v3 = vmax.f32 %v3904_v21, 0.0 }
  0xbe   : > { %v698_v25 = vpop.f32.mrf.mxu1 }
  0xc0   : > { %v604_v27 = vpop.f32.mrf.mxu0 }
  0xc1   : > { %3173 = vmatmul.msk.bf16.gmra.mxu1 %vm534_vm2, %v3086_v22  ;;  %v605_v28 = vadd.f32 %v3895_v11, %v604_v27  ;;  %v3511_v27 = vld [vmem:[%s3825_s8 + $0xf4] sm:$0xf] }
  0xc3   : > { %v3910_v29 = vadd.f32 %v693_v10, %v605_v28  ;;  %643 = vmatmul.bf16.gmra.mxu0 %v3074_v26  ;;  %v3123_v28 = vld [vmem:[%s3825_s8 + $0xf8] sm:$0xf0]  ;;  %s3716_s8 = smov 64  }
  0xc6   : > { %v3912_v30 = vpop.f32.mrf.mxu1 }
  0xc8   : > { %v606_v31 = vpop.f32.mrf.mxu0 }
  0xc9   : > { %v607_v32 = vadd.f32 %v3895_v11, %v606_v31  ;;  %v3126_v31 = vor.u32 %v3511_v27, %v3123_v28 }
  0xcb   : > { %v3917_v35 = vadd.f32 %v695_v16, %v607_v32  ;;  %v3118_v16 = vor.u32 %v3509_v13, %v3115_v14 }
  0xce   : > { %v703_v39 = vpop.f32.mrf.mxu1 }
  0xd0   : > { %v609_v41 = vpop.f32.mrf.mxu0 }
  0xd1   : > { %3174 = vmatmul.msk.bf16.gmra.mxu1 %vm534_vm2, %v3094_v36  ;;  %v610_v42 = vadd.f32 %v3895_v11, %v609_v41  ;;  %v3715_v41 = vmov 0.0  }
  0xd2   : > { %916 = vst.msk [vmem:[#allocation2 + $0x10] sm:$0xff] %vm912_vm3, %v3715_v41 }
  0xd3   : > { %v3925_v45 = vadd.f32 %v698_v25, %v610_v42  ;;  %648 = vmatmul.bf16.gmra.mxu0 %v3082_v40  ;;  %917 = vst.msk [vmem:[#allocation2 + $0x18] sm:$0x3] %vm914_vm4, %v3715_v41 }
  0xd4   : > { %913 = vst.msk [vmem:[#allocation2] sm:$0xff] %vm912_vm3, %v3715_v41 }
  0xd5   : > { %915 = vst.msk [vmem:[#allocation2 + $0x8] sm:$0x3] %vm914_vm4, %v3715_v41 }
  0xd6   : > { %v3927_v47 = vpop.f32.mrf.mxu1  ;;  %918 = vst.msk [vmem:[#allocation2 + $0x20] sm:$0xff] %vm912_vm3, %v3715_v41 }
  0xd7   : > { %919 = vst.msk [vmem:[#allocation2 + $0x28] sm:$0x3] %vm914_vm4, %v3715_v41 }
  0xd8   : > { %v3929_v48 = vpop.f32.mrf.mxu0  ;;  %920 = vst.msk [vmem:[#allocation2 + $0x30] sm:$0xff] %vm912_vm3, %v3715_v41 }
  0xd9   : > { %921 = vst.msk [vmem:[#allocation2 + $0x38] sm:$0x3] %vm914_vm4, %v3715_v41 }
  0xda   : > { %922 = vst.msk [vmem:[#allocation2 + $0x40] sm:$0xff] %vm912_vm3, %v3715_v41 }
  0xdb   : > { %923 = vst.msk [vmem:[#allocation2 + $0x48] sm:$0x3] %vm914_vm4, %v3715_v41 }
  0xdc   : > { %924 = vst.msk [vmem:[#allocation2 + $0x50] sm:$0xff] %vm912_vm3, %v3715_v41  ;;  %v960_v49 = vld [vmem:[#allocation2 + $0x1] sm:$0xff] }
  0xdd   : > { %925 = vst.msk [vmem:[#allocation2 + $0x58] sm:$0x3] %vm914_vm4, %v3715_v41  ;;  %v968_v50 = vpack.c.bf16 %v960_v49, %v960_v49 }
  0xde   : > { %v708_v54 = vpop.f32.mrf.mxu1  ;;  %926 = vst.msk [vmem:[#allocation2 + $0x60] sm:$0xff] %vm912_vm3, %v3715_v41 }
  0xdf   : > { %927 = vst.msk [vmem:[#allocation2 + $0x68] sm:$0x3] %vm914_vm4, %v3715_v41  ;;  %v1097_v52 = vunpack.c.l.b16 %v968_v50 }
  0xe0   : > { %v614_v56 = vpop.f32.mrf.mxu0  ;;  %928 = vst.msk [vmem:[#allocation2 + $0x70] sm:$0xff] %vm912_vm3, %v3715_v41 }
  0xe1   : > { %3175 = vmatmul.msk.bf16.gmra.mxu1 %vm534_vm2, %v3102_v51  ;;  %v615_v57 = vadd.f32 %v3895_v11, %v614_v56  ;;  %929 = vst.msk [vmem:[#allocation2 + $0x78] sm:$0x3] %vm914_vm4, %v3715_v41  ;;  %v1105_v53 = vpack.c.b16 %v1097_v52, %v1097_v52 }
  0xe2   : > { %930 = vst.msk [vmem:[#allocation2 + $0x80] sm:$0xff] %vm912_vm3, %v3715_v41 }
  0xe3   : > { %v3937_v58 = vadd.f32 %v703_v39, %v615_v57  ;;  %653 = vmatmul.bf16.gmra.mxu0 %v3090_v55  ;;  %931 = vst.msk [vmem:[#allocation2 + $0x88] sm:$0x3] %vm914_vm4, %v3715_v41  ;;  %1113 = vrot.lane.b32.xlu0 %v1105_v53, %s3716_s8 }
  0xe4   : > { %932 = vst.msk [vmem:[#allocation2 + $0x90] sm:$0xff] %vm912_vm3, %v3715_v41 }
  0xe5   : > { %933 = vst.msk [vmem:[#allocation2 + $0x98] sm:$0x3] %vm914_vm4, %v3715_v41 }
  0xe6   : > { %v3939_v59 = vpop.f32.mrf.mxu1 }
  0xe8   : > { %v3943_v63 = vpop.f32.mrf.mxu0 }
  0xee   : > { %v713_v5 = vpop.f32.mrf.mxu1 }
  0xf0   : > { %v619_v7 = vpop.f32.mrf.mxu0 }
  0xf1   : > { %3176 = vmatmul.msk.bf16.gmra.mxu1 %vm534_vm2, %v3110_v2  ;;  %v620_v8 = vadd.f32 %v3895_v11, %v619_v7  ;;  %v768_v2 = vmax.f32 %v3899_v15, 0.0 }
  0xf3   : > { %v3951_v9 = vadd.f32 %v708_v54, %v620_v8  ;;  %658 = vmatmul.bf16.gmra.mxu0 %v3098_v6 }
  0xf6   : > { %v3953_v10 = vpop.f32.mrf.mxu1 }
  0xf8   : > { %v3955_v12 = vpop.f32.mrf.mxu0 }
  0xfe   : > { %v718_v19 = vpop.f32.mrf.mxu1 }
 0x100   : > { %v624_v22 = vpop.f32.mrf.mxu0 }
 0x101   : > { %3177 = vmatmul.msk.bf16.gmra.mxu1 %vm534_vm2, %v3118_v16  ;;  %v625_v23 = vadd.f32 %v3895_v11, %v624_v22 }
 0x103   : > { %v3963_v24 = vadd.f32 %v713_v5, %v625_v23  ;;  %663 = vmatmul.bf16.gmra.mxu0 %v3106_v20 }
 0x106   : > { %v3965_v25 = vpop.f32.mrf.mxu1 }
 0x108   : > { %v3967_v26 = vpop.f32.mrf.mxu0 }
 0x10e   : > { %v723_v32 = vpop.f32.mrf.mxu1 }
 0x110   : > { %v629_v33 = vpop.f32.mrf.mxu0 }
 0x111   : > { %3178 = vmatmul.msk.bf16.gmra.mxu1 %vm534_vm2, %v3126_v31  ;;  %v630_v34 = vadd.f32 %v3895_v11, %v629_v33  ;;  %v770_v33 = vmax.f32 %v3910_v29, 0.0 }
 0x113   : > { %v3973_v36 = vadd.f32 %v718_v19, %v630_v34  ;;  %v771_v34 = vmax.f32 %v3917_v35, 0.0 }
 0x116   : > { %v3975_v37 = vpop.f32.mrf.mxu1 }
 0x118   : > { %v3977_v38 = vpop.f32.mrf.mxu0 }
 0x11e   : > { %v728_v39 = vpop.f32.mrf.mxu1 }
 0x120   : > { %v634_v40 = vpop.f32.mrf.mxu0 }
 0x121   : > { %v635_v42 = vadd.f32 %v3895_v11, %v634_v40 }
 0x123   : > { %v3983_v43 = vadd.f32 %v723_v32, %v635_v42 }
 0x126   : > { %v730_v44 = vpop.f32.mrf.mxu1 }
 0x128   : > { %v3990_v46 = vpop.f32.mrf.mxu0 }
 0x12e   : > { %v733_v51 = vpop.f32.mrf.mxu1 }
 0x130   : > { %v639_v54 = vpop.f32.mrf.mxu0 }
 0x131   : > { %v640_v55 = vadd.f32 %v3895_v11, %v639_v54 }
 0x133   : > { %v729_v56 = vadd.f32 %v728_v39, %v640_v55 }
 0x135   : > { %v784_v60 = vmax.f32 %v729_v56, 0.0 }
 0x136   : > { %v735_v57 = vpop.f32.mrf.mxu1 }
 0x137   : > { %v816_v0 = vrot.slane %v784_v60, 7  ;;  %v864_v6 = vmax.f32 %v768_v2, %v784_v60 }
 0x138   : > { %v641_v61 = vpop.f32.mrf.mxu0 }
 0x139   : > { %v642_v62 = vadd.f32 %v3895_v11, %v641_v61  ;;  %v848_v7 = vsel %vm583_vm0, 0.0, %v816_v0  ;;  %v612_v61 = vadd.f32 %v3895_v11, %v3929_v48 }
 0x13a   : > { %v880_v18 = vmax.f32 %v864_v6, %v848_v7  ;;  %v772_v7 = vmax.f32 %v3925_v45, 0.0 }
 0x13b   : > { %v731_v1 = vadd.f32 %v730_v44, %v642_v62 }
 0x13d   : > { %v785_v4 = vmax.f32 %v731_v1, 0.0 }
 0x13e   : > { %v738_v5 = vpop.f32.mrf.mxu1 }
 0x13f   : > { %v817_v8 = vrot.slane %v785_v4, 7  ;;  %v865_v13 = vmax.f32 %v769_v3, %v785_v4  ;;  %v701_v3 = vadd.f32 %v3912_v30, %v612_v61 }
 0x140   : > { %v644_v14 = vpop.f32.mrf.mxu0 }
 0x141   : > { %v849_v16 = vsel %vm583_vm0, 0.0, %v817_v8  ;;  %v645_v17 = vadd.f32 %v3895_v11, %v644_v14  ;;  %v773_v8 = vmax.f32 %v701_v3, 0.0 }
 0x142   : > { %v881_v19 = vmax.f32 %v865_v13, %v849_v16 }
 0x143   : > { %v734_v20 = vadd.f32 %v733_v51, %v645_v17 }
 0x144   : > { %v4012_v22 = vmax.f32 %v880_v18, %v881_v19 }
 0x145   : > { %v786_v23 = vmax.f32 %v734_v20, 0.0 }
 0x146   : > { %v740_v15 = vpop.f32.mrf.mxu1  ;;  %v904_v21 = vmax.f32 %v4012_v22, 0.0 }
 0x147   : > { %v818_v31 = vrot.slane %v786_v23, 7  ;;  %v866_v41 = vmax.f32 %v770_v33, %v786_v23 }
 0x148   : > { %935 = vst.msk [vmem:[#allocation2 + $0x11] sm:$0xff] %vm912_vm3, %v904_v21  ;;  %v646_v27 = vpop.f32.mrf.mxu0 }
 0x149   : > { %v647_v28 = vadd.f32 %v3895_v11, %v646_v27  ;;  %v850_v42 = vsel %vm583_vm0, 0.0, %v818_v31 }
 0x14a   : > { %v882_v55 = vmax.f32 %v866_v41, %v850_v42 }
 0x14b   : > { %v736_v32 = vadd.f32 %v735_v57, %v647_v28 }
 0x14d   : > { %v787_v39 = vmax.f32 %v736_v32, 0.0 }
 0x14e   : > { %v743_v40 = vpop.f32.mrf.mxu1 }
 0x14f   : > { %v819_v44 = vrot.slane %v787_v39, 7  ;;  %v867_v49 = vmax.f32 %v771_v34, %v787_v39  ;;  %v961_v50 = vld [vmem:[#allocation2 + $0x11] sm:$0xff]  ;;  %v617_v34 = vadd.f32 %v3895_v11, %v3943_v63 }
 0x150   : > { %v649_v51 = vpop.f32.mrf.mxu0  ;;  %v4022_v52 = vpack.c.bf16 %v961_v50, %v961_v50 }
 0x151   : > { %v851_v53 = vsel %vm583_vm0, 0.0, %v819_v44  ;;  %v650_v54 = vadd.f32 %v3895_v11, %v649_v51 }
 0x152   : > { %v883_v56 = vmax.f32 %v867_v49, %v851_v53  ;;  %v1098_v29 = vunpack.c.l.b16 %v4022_v52  ;;  %v706_v49 = vadd.f32 %v3927_v47, %v617_v34  ;;  %v774_v53 = vmax.f32 %v3937_v58, 0.0 }
 0x153   : > { %v739_v35 = vadd.f32 %v738_v5, %v650_v54 }
 0x154   : > { %v897_v57 = vmax.f32 %v882_v55, %v883_v56  ;;  %v1106_v60 = vpack.c.b16 %v1098_v29, %v1098_v29  ;;  %v775_v54 = vmax.f32 %v706_v49, 0.0 }
 0x155   : > { %v788_v1 = vmax.f32 %v739_v35, 0.0 }
 0x156   : > { %v745_v62 = vpop.f32.mrf.mxu1  ;;  %v4029_v0 = vmax.f32 %v897_v57, %v881_v19  ;;  %1115 = vrot.lane.b32.xlu0 %v1106_v60, %s3716_s8 }
 0x157   : > { %v820_v5 = vrot.slane %v788_v1, 7  ;;  %v868_v14 = vmax.f32 %v772_v7, %v788_v1 }
 0x158   : > { %936 = vst.msk [vmem:[#allocation2 + $0x21] sm:$0xff] %vm912_vm3, %v4029_v0  ;;  %v651_v2 = vpop.f32.mrf.mxu0 }
 0x159   : > { %v652_v4 = vadd.f32 %v3895_v11, %v651_v2  ;;  %v852_v16 = vsel %vm583_vm0, 0.0, %v820_v5 }
 0x15a   : > { %v884_v28 = vmax.f32 %v868_v14, %v852_v16 }
 0x15b   : > { %v741_v6 = vadd.f32 %v740_v15, %v652_v4 }
 0x15d   : > { %v789_v48 = vmax.f32 %v741_v6, 0.0 }
 0x15e   : > { %v748_v13 = vpop.f32.mrf.mxu1 }
 0x15f   : > { %v821_v17 = vrot.slane %v789_v48, 7  ;;  %v869_v18 = vmax.f32 %v773_v8, %v789_v48  ;;  %v962_v19 = vld [vmem:[#allocation2 + $0x21] sm:$0xff]  ;;  %v669_v8 = vpop.f32.mrf.mxu2 }
 0x160   : > { %v654_v20 = vpop.f32.mrf.mxu0  ;;  %v4038_v23 = vpack.c.bf16 %v962_v19, %v962_v19  ;;  %v1025_v63 = vld [vmem:[#allocation2 + $0x22] sm:$0xff]  ;;  %v622_v19 = vadd.f32 %v3895_v11, %v3955_v12  ;;  %v670_v12 = vadd.f32 %v3895_v11, %v669_v8  ;;  %v627_v8 = vadd.f32 %v3895_v11, %v3967_v26 }
 0x161   : > { %v853_v30 = vsel %vm583_vm0, 0.0, %v821_v17  ;;  %v655_v27 = vadd.f32 %v3895_v11, %v654_v20  ;;  %v4057_v1 = vpack.c.bf16 %v1025_v63, %v1025_v63 }
 0x162   : > { %v885_v15 = vmax.f32 %v869_v18, %v853_v30  ;;  %v1099_v45 = vunpack.c.l.b16 %v4038_v23 }
 0x163   : > { %v744_v31 = vadd.f32 %v743_v40, %v655_v27  ;;  %v4070_v16 = vunpack.c.l.b16 %v4057_v1 }
 0x164   : > { %v898_v32 = vmax.f32 %v884_v28, %v885_v15  ;;  %v4043_v33 = vpack.c.b16 %v1099_v45, %v1099_v45  ;;  %v711_v45 = vadd.f32 %v3939_v59, %v622_v19  ;;  %v632_v59 = vadd.f32 %v3895_v11, %v3977_v38 }
 0x165   : > { %v790_v42 = vmax.f32 %v744_v31, 0.0 }
 0x166   : > { %v750_v39 = vpop.f32.mrf.mxu1  ;;  %v4047_v41 = vmax.f32 %v898_v32, %v883_v56  ;;  %1117 = vrot.lane.b32.xlu1 %v4043_v33, %s3716_s8 }
 0x167   : > { %v822_v50 = vrot.slane %v790_v42, 7  ;;  %v870_v29 = vmax.f32 %v774_v53, %v790_v42  ;;  %v776_v42 = vmax.f32 %v3951_v9, 0.0 }
 0x168   : > { %937 = vst.msk [vmem:[#allocation2 + $0x31] sm:$0xff] %vm912_vm3, %v4047_v41  ;;  %v656_v44 = vpop.f32.mrf.mxu0 }
 0x169   : > { %v657_v40 = vadd.f32 %v3895_v11, %v656_v44  ;;  %v854_v35 = vsel %vm583_vm0, 0.0, %v822_v50  ;;  %v777_v44 = vmax.f32 %v711_v45, 0.0 }
 0x16a   : > { %v886_v5 = vmax.f32 %v870_v29, %v854_v35 }
 0x16b   : > { %v746_v51 = vadd.f32 %v745_v62, %v657_v40 }
 0x16d   : > { %v791_v55 = vmax.f32 %v746_v51, 0.0 }
 0x16e   : > { %v753_v56 = vpop.f32.mrf.mxu1 }
 0x16f   : > { %v823_v57 = vrot.slane %v791_v55, 7  ;;  %v871_v60 = vmax.f32 %v775_v54, %v791_v55  ;;  %v963_v61 = vld [vmem:[#allocation2 + $0x31] sm:$0xff] }
 0x170   : > { %v1026_v2 = vld [vmem:[#allocation2 + $0x32] sm:$0xff]  ;;  %v659_v47 = vpop.f32.mrf.mxu0  ;;  %v4059_v3 = vpack.c.bf16 %v963_v61, %v963_v61 }
 0x171   : > { %v4061_v4 = vpack.c.bf16 %v1026_v2, %v1026_v2  ;;  %v855_v58 = vsel %vm583_vm0, 0.0, %v823_v57  ;;  %v660_v62 = vadd.f32 %v3895_v11, %v659_v47 }
 0x172   : > { %v887_v6 = vmax.f32 %v871_v60, %v855_v58  ;;  %v1100_v7 = vunpack.c.l.b16 %v4059_v3  ;;  %v721_v58 = vadd.f32 %v3965_v25, %v632_v59  ;;  %v780_v25 = vmax.f32 %v3973_v36, 0.0 }
 0x173   : > { %v4067_v48 = vunpack.c.l.b16 %v4061_v4  ;;  %v749_v14 = vadd.f32 %v748_v13, %v660_v62  ;;  %v637_v59 = vadd.f32 %v3895_v11, %v3990_v46 }
 0x174   : > { %v899_v17 = vmax.f32 %v886_v5, %v887_v6  ;;  %v4072_v18 = vpack.c.b16 %v1100_v7, %v1100_v7 }
 0x175   : > { %v1504_v30 = vpack.c.b16 %v4067_v48, %v4070_v16  ;;  %v792_v28 = vmax.f32 %v749_v14, 0.0 }
 0x176   : > { %v755_v20 = vpop.f32.mrf.mxu1  ;;  %v4078_v27 = vmax.f32 %v899_v17, %v885_v15  ;;  %1119 = vrot.lane.b32.xlu1 %v4072_v18, %s3716_s8  ;;  %v671_v15 = vpop.f32.mrf.mxu2 }
 0x177   : > { %v824_v32 = vrot.slane %v792_v28, 7  ;;  %v872_v50 = vmax.f32 %v776_v42, %v792_v28  ;;  %v672_v38 = vadd.f32 %v3895_v11, %v671_v15 }
 0x178   : > { %938 = vst.msk [vmem:[#allocation2 + $0x41] sm:$0xff] %vm912_vm3, %v4078_v27  ;;  %v661_v13 = vpop.f32.mrf.mxu0 }
 0x179   : > { %v662_v31 = vadd.f32 %v3895_v11, %v661_v13  ;;  %v856_v53 = vsel %vm583_vm0, 0.0, %v824_v32  ;;  %v781_v13 = vmax.f32 %v721_v58, 0.0  ;;  %v3528_v58 = vld [vmem:[%s4933_s3 + $0x30] sm:$0xff] }
 0x17a   : > { %v888_v57 = vmax.f32 %v872_v50, %v856_v53 }
 0x17b   : > { %v751_v34 = vadd.f32 %v750_v39, %v662_v31 }
 0x17d   : > { %v793_v49 = vmax.f32 %v751_v34, 0.0 }
 0x17e   : > { %v758_v40 = vpop.f32.mrf.mxu1  ;;  %v674_v7 = vpop.f32.mrf.mxu2 }
 0x17f   : > { %v759_v51 = vadd.f32 %v758_v40, %v670_v12  ;;  %v825_v63 = vrot.slane %v793_v49, 7  ;;  %v873_v54 = vmax.f32 %v777_v44, %v793_v49  ;;  %v964_v55 = vld [vmem:[#allocation2 + $0x41] sm:$0xff]  ;;  %v716_v12 = vadd.f32 %v3953_v10, %v627_v8 }
 0x180   : > { %v664_v29 = vpop.f32.mrf.mxu0  ;;  %v4091_v35 = vpack.c.bf16 %v964_v55, %v964_v55  ;;  %v675_v15 = vadd.f32 %v3895_v11, %v674_v7  ;;  %v1027_v49 = vld [vmem:[#allocation2 + $0x42] sm:$0xff]  ;;  %v778_v40 = vmax.f32 %v3963_v24, 0.0  ;;  %v3529_v55 = vld [vmem:[%s4933_s3 + $0x38] sm:$0xff] }
 0x181   : > { %v857_v39 = vsel %vm583_vm0, 0.0, %v825_v63  ;;  %v665_v9 = vadd.f32 %v3895_v11, %v664_v29  ;;  %v796_v61 = vmax.f32 %v759_v51, 0.0  ;;  %v779_v51 = vmax.f32 %v716_v12, 0.0  ;;  %1764 = vmatpush.bf16.msrb.mxu2 %v3529_v55 }
 0x182   : > { %v4095_v60 = vmax.f32 %v873_v54, %v857_v39  ;;  %v1101_v2 = vunpack.c.l.b16 %v4091_v35 }
 0x183   : > { %v754_v47 = vadd.f32 %v753_v56, %v665_v9  ;;  %v828_v19 = vrot.slane %v796_v61, 7  ;;  %v876_v26 = vmax.f32 %v780_v25, %v796_v61  ;;  %v4125_v9 = vpack.c.bf16 %v1027_v49, %v1027_v49 }
 0x184   : > { %v900_v62 = vmax.f32 %v888_v57, %v4095_v60  ;;  %v4101_v5 = vpack.c.b16 %v1101_v2, %v1101_v2 }
 0x185   : > { %v794_v56 = vmax.f32 %v754_v47, 0.0  ;;  %v860_v32 = vsel %vm583_vm0, 0.0, %v828_v19  ;;  %1765 = vmatpush.bf16.msrb.mxu2 %v3528_v58 }
 0x186   : > { %v760_v14 = vpop.f32.mrf.mxu1  ;;  %v4105_v17 = vmax.f32 %v900_v62, %v887_v6  ;;  %1121 = vrot.lane.b32.xlu2 %v4101_v5, %s3716_s8  ;;  %v892_v53 = vmax.f32 %v876_v26, %v860_v32  ;;  %v676_v39 = vpop.f32.mrf.mxu2 }
 0x187   : > { %v761_v28 = vadd.f32 %v760_v14, %v672_v38  ;;  %v826_v44 = vrot.slane %v794_v56, 7  ;;  %v874_v29 = vmax.f32 %v778_v40, %v794_v56  ;;  %v677_v8 = vadd.f32 %v3895_v11, %v676_v39  ;;  %v992_v14 = vld [vmem:[#allocation2 + $0x10] sm:$0xff] }
 0x188   : > { %939 = vst.msk [vmem:[#allocation2 + $0x51] sm:$0xff] %vm912_vm3, %v4105_v17  ;;  %v666_v31 = vpop.f32.mrf.mxu0 }
 0x189   : > { %v797_v45 = vmax.f32 %v761_v28, 0.0  ;;  %v667_v6 = vadd.f32 %v3895_v11, %v666_v31  ;;  %v858_v24 = vsel %vm583_vm0, 0.0, %v826_v44  ;;  %v4150_v11 = vpack.c.bf16 %v992_v14, %v992_v14  ;;  %v3527_v44 = vld [vmem:[%s4933_s3 + $0x28] sm:$0xff]  ;;  %v993_v14 = vld [vmem:[#allocation2 + $0x20] sm:$0xff] }
 0x18a   : > { %v890_v19 = vmax.f32 %v874_v29, %v858_v24  ;;  %1766 = vmatpush.bf16.msrb.mxu2 %v3527_v44 }
 0x18b   : > { %v829_v34 = vrot.slane %v797_v45, 7  ;;  %v877_v42 = vmax.f32 %v781_v13, %v797_v45  ;;  %v756_v36 = vadd.f32 %v755_v20, %v667_v6  ;;  %v726_v13 = vadd.f32 %v3975_v37, %v637_v59 }
 0x18c   : > { %v4141_v45 = vunpack.c.l.b16 %v4125_v9  ;;  %v1137_v40 = vunpack.c.l.b16 %v4150_v11 }
 0x18d   : > { %v861_v50 = vsel %vm583_vm0, 0.0, %v829_v34  ;;  %v795_v10 = vmax.f32 %v756_v36, 0.0  ;;  %v782_v36 = vmax.f32 %v3983_v43, 0.0  ;;  %v783_v49 = vmax.f32 %v726_v13, 0.0 }
 0x18e   : > { %v4118_v63 = vmax.f32 %v877_v42, %v861_v50  ;;  %v763_v54 = vpop.f32.mrf.mxu1  ;;  %v3526_v50 = vld [vmem:[%s4933_s3 + $0x20] sm:$0xff]  ;;  %v1145_v43 = vpack.c.b16 %v1137_v40, %v1137_v40 }
 0x18f   : > { %v764_v20 = vadd.f32 %v763_v54, %v675_v15  ;;  %v827_v61 = vrot.slane %v795_v10, 7  ;;  %v875_v2 = vmax.f32 %v779_v51, %v795_v10  ;;  %v965_v47 = vld [vmem:[#allocation2 + $0x51] sm:$0xff]  ;;  %1767 = vmatpush.bf16.msrb.mxu2 %v3526_v50  ;;  %v995_v50 = vld [vmem:[#allocation2 + $0x40] sm:$0xff] }
 0x190   : > { %v902_v57 = vmax.f32 %v892_v53, %v4118_v63  ;;  %v1028_v62 = vld [vmem:[#allocation2 + $0x52] sm:$0xff]  ;;  %v4132_v38 = vpack.c.bf16 %v965_v47, %v965_v47 }
 0x191   : > { %v4134_v46 = vpack.c.bf16 %v1028_v62, %v1028_v62  ;;  %v859_v7 = vsel %vm583_vm0, 0.0, %v827_v61  ;;  %v798_v25 = vmax.f32 %v764_v20, 0.0  ;;  %v1024_v47 = vld [vmem:[#allocation2 + $0x12] sm:$0xff] }
 0x192   : > { %v891_v28 = vmax.f32 %v875_v2, %v859_v7  ;;  %v1102_v56 = vunpack.c.l.b16 %v4132_v38 }
 0x193   : > { %v4144_v31 = vunpack.c.l.b16 %v4134_v46  ;;  %v830_v42 = vrot.slane %v798_v25, 7  ;;  %v878_v51 = vmax.f32 %v782_v36, %v798_v25 }
 0x194   : > { %v901_v12 = vmax.f32 %v890_v19, %v891_v28  ;;  %v4146_v26 = vmax.f32 %v902_v57, %v891_v28  ;;  %v4148_v6 = vpack.c.b16 %v1102_v56, %v1102_v56  ;;  %v3525_v57 = vld [vmem:[%s4933_s3 + $0x18] sm:$0xff]  ;;  %v3524_v19 = vld [vmem:[%s4933_s3 + $0x10] sm:$0xff] }
 0x195   : > { %v1509_v34 = vpack.c.b16 %v4144_v31, %v4141_v45  ;;  %v862_v53 = vsel %vm583_vm0, 0.0, %v830_v42  ;;  %1768 = vmatpush.bf16.msrb.mxu2 %v3525_v57  ;;  %v996_v57 = vld [vmem:[#allocation2 + $0x50] sm:$0xff] }
 0x196   : > { %v765_v32 = vpop.f32.mrf.mxu1  ;;  %v4155_v37 = vmax.f32 %v901_v12, %v4095_v60  ;;  %941 = vst.msk [vmem:[#allocation2 + $0x71] sm:$0xff] %vm912_vm3, %v4146_v26  ;;  %1123 = vrot.lane.b32.xlu2 %v4148_v6, %s3716_s8  ;;  %v894_v59 = vmax.f32 %v878_v51, %v862_v53  ;;  %v4195_v12 = vpack.c.bf16 %v1024_v47, %v1024_v47  ;;  %v994_v53 = vld [vmem:[#allocation2 + $0x30] sm:$0xff] }
 0x197   : > { %v766_v15 = vadd.f32 %v765_v32, %v677_v8  ;;  %v4199_v32 = vpack.c.bf16 %v993_v14, %v993_v14 }
 0x198   : > { %940 = vst.msk [vmem:[#allocation2 + $0x61] sm:$0xff] %vm912_vm3, %v4155_v37 }
 0x199   : > { %v799_v60 = vmax.f32 %v766_v15, 0.0  ;;  %1769 = vmatpush.bf16.msrb.mxu2 %v3524_v19  ;;  %v1138_v40 = vunpack.c.l.b16 %v4199_v32 }
 0x19b   : > { %v831_v10 = vrot.slane %v799_v60, 7  ;;  %v879_v54 = vmax.f32 %v783_v49, %v799_v60  ;;  %v1177_v49 = vunpack.c.l.b16 %v4195_v12  ;;  %v3523_v60 = vld [vmem:[%s4933_s3 + $0x8] sm:$0xff] }
 0x19d   : > { %v863_v55 = vsel %vm583_vm0, 0.0, %v831_v10  ;;  %v967_v20 = vld [vmem:[#allocation2 + $0x71] sm:$0xff]  ;;  %1770 = vmatpush.bf16.msrb.mxu2 %v3523_v60  ;;  %v1185_v10 = vpack.c.b16 %v1177_v49, %v1177_v49 }
 0x19e   : > { %v895_v29 = vmax.f32 %v879_v54, %v863_v55  ;;  %v1030_v39 = vld [vmem:[#allocation2 + $0x72] sm:$0xff]  ;;  %1153 = vrot.lane.b32.xlu2 %v1145_v43, %s3716_s8  ;;  %v4174_v24 = vpack.c.bf16 %v967_v20, %v967_v20  ;;  %v4223_v54 = vpack.c.bf16 %v995_v50, %v995_v50  ;;  %v3522_v55 = vld [vmem:[%s4933_s3] sm:$0xff]  ;;  %v1146_v43 = vpack.c.b16 %v1138_v40, %v1138_v40 }
 0x19f   : > { %v966_v2 = vld [vmem:[#allocation2 + $0x61] sm:$0xff]  ;;  %v4179_v62 = vpack.c.bf16 %v1030_v39, %v1030_v39  ;;  %v4233_v20 = vpack.c.bf16 %v994_v53, %v994_v53  ;;  %v998_v47 = vld [vmem:[#allocation2 + $0x70] sm:$0xff] }
 0x1a0   : > { %v903_v61 = vmax.f32 %v894_v59, %v895_v29  ;;  %v1029_v58 = vld [vmem:[#allocation2 + $0x62] sm:$0xff]  ;;  %v1104_v7 = vunpack.c.l.b16 %v4174_v24  ;;  %v4182_v8 = vpack.c.bf16 %v966_v2, %v966_v2  ;;  %v1187_v59 = vpack.c.b16 %v4067_v48, %v4067_v48 }
 0x1a1   : > { %v4190_v25 = vpack.c.bf16 %v1029_v58, %v1029_v58  ;;  %v4205_v15 = vunpack.c.l.b16 %v4179_v62  ;;  %v997_v51 = vld [vmem:[#allocation2 + $0x60] sm:$0xff]  ;;  %1771 = vmatpush.bf16.msrb.mxu2 %v3522_v55  ;;  %v1140_v39 = vunpack.c.l.b16 %v4223_v54  ;;  %v1139_v2 = vunpack.c.l.b16 %v4233_v20 }
 0x1a2   : > { %v4188_v28 = vmax.f32 %v903_v61, %v4118_v63  ;;  %v4192_v56 = vpack.c.b16 %v1104_v7, %v1104_v7  ;;  %v1103_v13 = vunpack.c.l.b16 %v4182_v8  ;;  %v1186_v63 = vpack.c.b16 %v4070_v16, %v4070_v16  ;;  %v944_v55 = vld [vmem:[#allocation2] sm:$0xff] }
 0x1a3   : > { %v4202_v42 = vunpack.c.l.b16 %v4190_v25  ;;  %v4231_v29 = vpack.c.bf16 %v997_v51, %v997_v51  ;;  %v1148_v58 = vpack.c.b16 %v1140_v39, %v1140_v39  ;;  %v4240_v7 = vpack.c.bf16 %v996_v57, %v996_v57 }
 0x1a4   : > { %942 = vst.msk [vmem:[#allocation2 + $0x81] sm:$0xff] %vm912_vm3, %v4188_v28  ;;  %1127 = vrot.lane.b32.xlu1 %v4192_v56, %s3716_s8  ;;  %v4211_v44 = vpack.c.b16 %v1103_v13, %v1103_v13  ;;  %v1147_v19 = vpack.c.b16 %v1139_v2, %v1139_v2  ;;  %v4243_v13 = vpack.c.bf16 %v998_v47, %v998_v47 }
 0x1a5   : > { %v1514_v36 = vpack.c.b16 %v4205_v15, %v4202_v42  ;;  %v1142_v61 = vunpack.c.l.b16 %v4231_v29  ;;  %v1188_v51 = vpack.c.b16 %v4141_v45, %v4141_v45  ;;  %v1190_v57 = vpack.c.b16 %v4202_v42, %v4202_v42 }
 0x1a6   : > { %1195 = vrot.lane.b32.xlu2 %v1186_v63, %s3716_s8  ;;  %1125 = vrot.lane.b32.xlu0 %v4211_v44, %s3716_s8  ;;  %v1141_v63 = vunpack.c.l.b16 %v4240_v7  ;;  %v1143_v49 = vunpack.c.l.b16 %v4243_v13  ;;  %v1189_v2 = vpack.c.b16 %v4144_v31, %v4144_v31 }
 0x1a7   : > { %v1150_v14 = vpack.c.b16 %v1142_v61, %v1142_v61 }
 0x1a8   : > { %v1149_v40 = vpack.c.b16 %v1141_v63, %v1141_v63  ;;  %v1151_v50 = vpack.c.b16 %v1143_v49, %v1143_v49 }
 0x1ab   : > { %v1031_v60 = vld [vmem:[#allocation2 + $0x82] sm:$0xff] }
 0x1ac   : > { %1193 = vrot.lane.b32.xlu1 %v1185_v10, %s3716_s8  ;;  %v1039_v53 = vpack.c.bf16 %v1031_v60, %v1031_v60  ;;  %v1114_v10 = vpop.permute.xlu0 %1113  ;;  %v999_v39 = vld [vmem:[#allocation2 + $0x80] sm:$0xff] }
 0x1ad   : > { %v4263_v47 = vpack.c.bf16 %v999_v39, %v999_v39 }
 0x1ae   : > { %1197 = vrot.lane.b32.xlu2 %v1187_v59, %s3716_s8  ;;  %1155 = vrot.lane.b32.xlu0 %v1146_v43, %s3716_s8  ;;  %v4254_v43 = vunpack.c.l.b16 %v1039_v53  ;;  %v952_v59 = vpack.c.bf16 %v944_v55, %v944_v55  ;;  %v3545_v53 = vld [vmem:[%s4933_s3 + $0xb8] sm:$0xff]  ;;  %v1063_v55 = vld [vmem:[#allocation2 + $0x81] sm:$0xff] }
 0x1af   : > { %v1144_v63 = vunpack.c.l.b16 %v4263_v47  ;;  %1822 = vmatpush.bf16.msra.mxu2 %v3545_v53  ;;  %v4291_v39 = vpack.c.bf16 %v1063_v55, %v1063_v55  ;;  %v3533_v55 = vld [vmem:[%s4933_s3 + $0x58] sm:$0xff] }
 0x1b0   : > { %v1192_v61 = vpack.c.b16 %v4254_v43, %v4254_v43 }
 0x1b4   : > { %1159 = vrot.lane.b32.xlu1 %v1148_v58, %s3716_s8  ;;  %v1251_v58 = vsel %vm912_vm3, %v952_v59, %v1114_v10  ;;  %v1064_v10 = vld [vmem:[#allocation2 + $0x91] sm:$0xff] }
 0x1b6   : > { %1163 = vrot.lane.b32.xlu2 %v1150_v14, %s3716_s8  ;;  %1157 = vrot.lane.b32.xlu0 %v1147_v19, %s3716_s8  ;;  %v1385_v14 = vunpack.c.l.b16 %v1251_v58 }
 0x1bc   : > { %1161 = vrot.lane.b32.xlu1 %v1149_v40, %s3716_s8  ;;  %v1191_v40 = vpack.c.b16 %v4205_v15, %v4205_v15  ;;  %v3589_v15 = vld [vmem:[%s4935_s5 + $0xf8] sm:$0xff] }
 0x1bd   : > { %2832 = vmatpush.bf16.msrb.mxu1 %v3589_v15 }
 0x1be   : > { %1165 = vrot.lane.b32.xlu2 %v1151_v50, %s3716_s8  ;;  %1199 = vrot.lane.b32.xlu0 %v1188_v51, %s3716_s8  ;;  %v1152_v50 = vpack.c.b16 %v1144_v63, %v1144_v63 }
 0x1c4   : > { %1203 = vrot.lane.b32.xlu1 %v1190_v57, %s3716_s8 }
 0x1c6   : > { %1207 = vrot.lane.b32.xlu2 %v1192_v61, %s3716_s8  ;;  %1201 = vrot.lane.b32.xlu0 %v1189_v2, %s3716_s8  ;;  %v1223_v61 = vunpack.c.l.b16 %v4291_v39 }
 0x1c8   : > { %v1116_v19 = vpop.permute.xlu0 %1115 }
 0x1c9   : > { %v1254_v49 = vsel %vm912_vm3, %v4150_v11, %v1116_v19  ;;  %v3544_v11 = vld [vmem:[%s4933_s3 + $0xb0] sm:$0xff] }
 0x1ca   : > { %v1390_v60 = vunpack.c.l.b16 %v1254_v49  ;;  %1823 = vmatpush.bf16.msra.mxu2 %v3544_v11  ;;  %v3534_v11 = vld [vmem:[%s4933_s3 + $0x60] sm:$0xff] }
 0x1cc   : > { %1205 = vrot.lane.b32.xlu1 %v1191_v40, %s3716_s8  ;;  %v1500_v51 = vpack.c.b16 %v1390_v60, %v1385_v14  ;;  %v3536_v60 = vld [vmem:[%s4933_s3 + $0x70] sm:$0xff]  ;;  %v3541_v40 = vld [vmem:[%s4933_s3 + $0x98] sm:$0xff] }
 0x1ce   : > { %1237 = vrot.lane.b32.xlu2 %v4101_v5, %s3716_s8  ;;  %1167 = vrot.lane.b32.xlu0 %v1152_v50, %s3716_s8  ;;  %v1072_v5 = vpack.c.bf16 %v1064_v10, %v1064_v10  ;;  %v3540_v10 = vld [vmem:[%s4933_s3 + $0x90] sm:$0xff] }
 0x1cf   : > { %1772 = vmatmul.bf16.vlgmr.msrb.gmra.mxu2 %v1500_v51  ;;  %v3535_v51 = vld [vmem:[%s4933_s3 + $0x68] sm:$0xff] }
 0x1d0   : > { %v1224_v59 = vunpack.c.l.b16 %v1072_v5 }
 0x1d4   : > { %1235 = vrot.lane.b32.xlu1 %v4072_v18, %s3716_s8  ;;  %v3543_v18 = vld [vmem:[%s4933_s3 + $0xa8] sm:$0xff] }
 0x1d5   : > { %1824 = vmatpush.bf16.msra.mxu2 %v3543_v18 }
 0x1d6   : > { %1243 = vrot.lane.b32.xlu2 %v4192_v56, %s3716_s8  ;;  %1233 = vrot.lane.b32.xlu0 %v4043_v33, %s3716_s8  ;;  %v1232_v56 = vpack.c.b16 %v1224_v59, %v1224_v59  ;;  %v3542_v33 = vld [vmem:[%s4933_s3 + $0xa0] sm:$0xff] }
 0x1d8   : > { %v1118_v57 = vpop.permute.xlu1 %1117 }
 0x1d9   : > { %1825 = vmatpush.bf16.msra.mxu2 %v3542_v33  ;;  %v1257_v2 = vsel %vm912_vm3, %v4199_v32, %v1118_v57 }
 0x1da   : > { %v1395_v19 = vunpack.c.l.b16 %v1257_v2  ;;  %v3538_v2 = vld [vmem:[%s4933_s3 + $0x80] sm:$0xff] }
 0x1dc   : > { %1241 = vrot.lane.b32.xlu1 %v4211_v44, %s3716_s8  ;;  %v3537_v44 = vld [vmem:[%s4933_s3 + $0x78] sm:$0xff] }
 0x1dd   : > { %1793 = vmatpush.bf16.msra.mxu3 %v3537_v44  ;;  %1826 = vmatpush.bf16.msra.mxu2 %v3541_v40  ;;  %v3531_v44 = vld [vmem:[%s4933_s3 + $0x48] sm:$0xff] }
 0x1de   : > { %1239 = vrot.lane.b32.xlu0 %v4148_v6, %s3716_s8  ;;  %v1231_v6 = vpack.c.b16 %v1223_v61, %v1223_v61  ;;  %v3539_v61 = vld [vmem:[%s4933_s3 + $0x88] sm:$0xff] }
 0x1e0   : > { %v1122_v63 = vpop.permute.xlu2 %1121 }
 0x1e1   : > { %1794 = vmatpush.bf16.msra.mxu3 %v3536_v60  ;;  %1827 = vmatpush.bf16.msra.mxu2 %v3540_v10  ;;  %v1263_v59 = vsel %vm912_vm3, %v4223_v54, %v1122_v63  ;;  %v976_v60 = vld [vmem:[#allocation2 + $0x2] sm:$0xff] }
 0x1e2   : > { %v1405_v57 = vunpack.c.l.b16 %v1263_v59  ;;  %v3551_v10 = vld [vmem:[%s4933_s3 + $0xe8] sm:$0xff] }
 0x1e4   : > { %1247 = vrot.lane.b32.xlu1 %v1232_v56, %s3716_s8  ;;  %v3532_v56 = vld [vmem:[%s4933_s3 + $0x50] sm:$0xff] }
 0x1e5   : > { %1795 = vmatpush.bf16.msra.mxu3 %v3535_v51  ;;  %1828 = vmatpush.bf16.msra.mxu2 %v3539_v61 }
 0x1e6   : > { %1245 = vrot.lane.b32.xlu0 %v1231_v6, %s3716_s8  ;;  %v3530_v6 = vld [vmem:[%s4933_s3 + $0x40] sm:$0xff] }
 0x1e8   : > { %v1120_v58 = vpop.permute.xlu1 %1119 }
 0x1e9   : > { %v1260_v14 = vsel %vm912_vm3, %v4233_v20, %v1120_v58  ;;  %1796 = vmatpush.bf16.msra.mxu3 %v3534_v11  ;;  %1829 = vmatpush.bf16.msra.mxu2 %v3538_v2  ;;  %v3553_v58 = vld [vmem:[%s4933_s3 + $0xf8] sm:$0xff] }
 0x1ea   : > { %v1400_v49 = vunpack.c.l.b16 %v1260_v14  ;;  %v3557_v14 = vld [vmem:[%s4933_s3 + $0x118] sm:$0xff] }
 0x1ec   : > { %v1505_v50 = vpack.c.b16 %v1400_v49, %v1395_v19  ;;  %v3552_v19 = vld [vmem:[%s4933_s3 + $0xf0] sm:$0xff] }
 0x1ed   : > { %1797 = vmatpush.bf16.msra.mxu3 %v3533_v55  ;;  %1884 = vmatpush.bf16.msrb.mxu2 %v3557_v14 }
 0x1ee   : > { %1777 = vmatmul.bf16.gmra.mxu2 %v1505_v50 }
 0x1f0   : > { %v1124_v53 = vpop.permute.xlu2 %1123 }
 0x1f1   : > { %v1266_v5 = vsel %vm912_vm3, %v4240_v7, %v1124_v53  ;;  %1798 = vmatpush.bf16.msra.mxu3 %v3532_v56 }
 0x1f2   : > { %v1410_v18 = vunpack.c.l.b16 %v1266_v5  ;;  %v984_v5 = vpack.c.bf16 %v976_v60, %v976_v60  ;;  %v3549_v60 = vld [vmem:[%s4933_s3 + $0xd8] sm:$0xff] }
 0x1f4   : > { %v1510_v33 = vpack.c.b16 %v1410_v18, %v1405_v57  ;;  %v3556_v57 = vld [vmem:[%s4933_s3 + $0x110] sm:$0xff] }
 0x1f5   : > { %1799 = vmatpush.bf16.msra.mxu3 %v3531_v44  ;;  %1885 = vmatpush.bf16.msrb.mxu2 %v3556_v57 }
 0x1f8   : > { %v1154_v51 = vpop.permute.xlu2 %1153 }
 0x1f9   : > { %1800 = vmatpush.bf16.msra.mxu3 %v3530_v6  ;;  %v1275_v59 = vsel %vm912_vm3, %v984_v5, %v1154_v51  ;;  %v3550_v6 = vld [vmem:[%s4933_s3 + $0xe0] sm:$0xff] }
 0x1fa   : > { %v1386_v61 = vunpack.c.l.b16 %v1275_v59 }
 0x1fd   : > { %1851 = vmatpush.bf16.msrb.mxu3 %v3553_v58 }
 0x1fe   : > { %1782 = vmatmul.bf16.gmra.mxu2 %v1510_v33 }
 0x200   : > { %v1196_v2 = vpop.permute.xlu2 %1195 }
 0x201   : > { %1852 = vmatpush.bf16.msrb.mxu3 %v3552_v19  ;;  %v1302_v19 = vsel %vm912_vm3, %v4038_v23, %v1196_v2  ;;  %v3555_v23 = vld [vmem:[%s4933_s3 + $0x108] sm:$0xff] }
 0x202   : > { %1886 = vmatpush.bf16.msrb.mxu2 %v3555_v23 }
 0x205   : > { %1853 = vmatpush.bf16.msrb.mxu3 %v3551_v10 }
 0x209   : > { %1854 = vmatpush.bf16.msrb.mxu3 %v3550_v6 }
 0x20d   : > { %1855 = vmatpush.bf16.msrb.mxu3 %v3549_v60 }
 0x216   : > { %v1128_v63 = vpop.permute.xlu1 %1127 }
 0x217   : > { %v1272_v49 = vsel %vm912_vm3, %v4243_v13, %v1128_v63 }
 0x218   : > { %v1126_v40 = vpop.permute.xlu0 %1125  ;;  %v1420_v53 = vunpack.c.l.b16 %v1272_v49  ;;  %v1392_v49 = vunpack.c.l.b16 %v1302_v19 }
 0x219   : > { %v1269_v50 = vsel %vm912_vm3, %v4231_v29, %v1126_v40 }
 0x21a   : > { %v1415_v11 = vunpack.c.l.b16 %v1269_v50 }
 0x21c   : > { %v1515_v55 = vpack.c.b16 %v1420_v53, %v1415_v11  ;;  %v1198_v11 = vpop.permute.xlu2 %1197 }
 0x21e   : > { %1787 = vmatmul.bf16.gmra.mxu2 %v1515_v55  ;;  %v1194_v33 = vpop.permute.xlu1 %1193  ;;  %v3548_v55 = vld [vmem:[%s4933_s3 + $0xd0] sm:$0xff] }
 0x21f   : > { %v1299_v14 = vsel %vm912_vm3, %v4022_v52, %v1194_v33  ;;  %1856 = vmatpush.bf16.msrb.mxu3 %v3548_v55 }
 0x220   : > { %v1156_v18 = vpop.permute.xlu0 %1155  ;;  %v1387_v63 = vunpack.c.l.b16 %v1299_v14 }
 0x221   : > { %v1278_v56 = vsel %vm912_vm3, %v4195_v12, %v1156_v18 }
 0x222   : > { %v1391_v44 = vunpack.c.l.b16 %v1278_v56  ;;  %v1502_v40 = vpack.c.b16 %v1392_v49, %v1387_v63 }
 0x224   : > { %v1501_v58 = vpack.c.b16 %v1391_v44, %v1386_v61  ;;  %v3547_v61 = vld [vmem:[%s4933_s3 + $0xc8] sm:$0xff]  ;;  %v1164_v33 = vpop.permute.xlu2 %1163 }
 0x225   : > { %1857 = vmatpush.bf16.msrb.mxu3 %v3547_v61  ;;  %v1290_v2 = vsel %vm912_vm3, %v4134_v46, %v1164_v33 }
 0x226   : > { %1801 = vmatmul.bf16.vlgmr.msra.gmra.mxu3 %v1501_v58  ;;  %v1160_v50 = vpop.permute.xlu1 %1159  ;;  %v1411_v19 = vunpack.c.l.b16 %v1290_v2 }
 0x227   : > { %v1284_v52 = vsel %vm912_vm3, %v4061_v4, %v1160_v50  ;;  %v1305_v4 = vsel %vm912_vm3, %v4059_v3, %v1198_v11  ;;  %v3546_v3 = vld [vmem:[%s4933_s3 + $0xc0] sm:$0xff] }
 0x228   : > { %v1158_v12 = vpop.permute.xlu0 %1157  ;;  %v1401_v10 = vunpack.c.l.b16 %v1284_v52  ;;  %v1397_v57 = vunpack.c.l.b16 %v1305_v4 }
 0x229   : > { %v1281_v51 = vsel %vm912_vm3, %v4057_v1, %v1158_v12  ;;  %1858 = vmatpush.bf16.msrb.mxu3 %v3546_v3 }
 0x22a   : > { %v1396_v53 = vunpack.c.l.b16 %v1281_v51 }
 0x22c   : > { %v1506_v59 = vpack.c.b16 %v1401_v10, %v1396_v53 }
 0x22e   : > { %1830 = vmatmul.bf16.vlgmr.msra.gmra.mxu2 %v1502_v40  ;;  %v1162_v56 = vpop.permute.xlu1 %1161  ;;  %v1166_v40 = vpop.permute.xlu2 %1165 }
 0x22f   : > { %v1287_v6 = vsel %vm912_vm3, %v4125_v9, %v1162_v56  ;;  %v1293_v53 = vsel %vm912_vm3, %v4190_v25, %v1166_v40  ;;  %v1080_v40 = vld [vmem:[#allocation2 + $0x92] sm:$0xff] }
 0x230   : > { %v1200_v5 = vpop.permute.xlu0 %1199  ;;  %v1406_v58 = vunpack.c.l.b16 %v1287_v6  ;;  %v1416_v11 = vunpack.c.l.b16 %v1293_v53 }
 0x231   : > { %v1308_v1 = vsel %vm912_vm3, %v4091_v35, %v1200_v5  ;;  %v3554_v35 = vld [vmem:[%s4933_s3 + $0x100] sm:$0xff] }
 0x232   : > { %v1402_v18 = vunpack.c.l.b16 %v1308_v1  ;;  %1887 = vmatpush.bf16.msrb.mxu2 %v3554_v35  ;;  %v1511_v9 = vpack.c.b16 %v1411_v19, %v1406_v58 }
 0x234   : > { %v1507_v44 = vpack.c.b16 %v1402_v18, %v1397_v57 }
 0x236   : > { %1806 = vmatmul.bf16.gmra.mxu3 %v1506_v59  ;;  %v1204_v63 = vpop.permute.xlu1 %1203 }
 0x237   : > { %v1314_v49 = vsel %vm912_vm3, %v4182_v8, %v1204_v63 }
 0x238   : > { %v1202_v14 = vpop.permute.xlu0 %1201  ;;  %v1412_v50 = vunpack.c.l.b16 %v1314_v49 }
 0x239   : > { %v1311_v12 = vsel %vm912_vm3, %v4132_v38, %v1202_v14  ;;  %v1208_v38 = vpop.permute.xlu2 %1207 }
 0x23a   : > { %v1407_v60 = vunpack.c.l.b16 %v1311_v12  ;;  %v1320_v55 = vsel %vm912_vm3, %v4291_v39, %v1208_v38 }
 0x23b   : > { %v1422_v1 = vunpack.c.l.b16 %v1320_v55  ;;  %v3593_v55 = vld [vmem:[%s4935_s5 + $0x118] sm:$0xff] }
 0x23c   : > { %v1512_v52 = vpack.c.b16 %v1412_v50, %v1407_v60  ;;  %2865 = vmatpush.bf16.msrb.mxu0 %v3593_v55 }
 0x23e   : > { %1835 = vmatmul.bf16.gmra.mxu2 %v1507_v44  ;;  %v1206_v10 = vpop.permute.xlu1 %1205 }
 0x23f   : > { %v1317_v8 = vsel %vm912_vm3, %v4174_v24, %v1206_v10 }
 0x240   : > { %v1168_v51 = vpop.permute.xlu0 %1167  ;;  %v1417_v59 = vunpack.c.l.b16 %v1317_v8 }
 0x241   : > { %v1296_v46 = vsel %vm912_vm3, %v4179_v62, %v1168_v51  ;;  %v1238_v39 = vpop.permute.xlu2 %1237  ;;  %v1088_v51 = vpack.c.bf16 %v1080_v40, %v1080_v40 }
 0x242   : > { %v1421_v23 = vunpack.c.l.b16 %v1296_v46  ;;  %v1517_v18 = vpack.c.b16 %v1422_v1, %v1417_v59 }
 0x244   : > { %v1516_v5 = vpack.c.b16 %v1421_v23, %v1416_v11 }
 0x246   : > { %1811 = vmatmul.bf16.gmra.mxu3 %v1511_v9  ;;  %v1236_v62 = vpop.permute.xlu1 %1235  ;;  %v1048_v9 = vld [vmem:[#allocation2 + $0x90] sm:$0xff] }
 0x247   : > { %v1326_v57 = vsel %vm912_vm3, %v4233_v20, %v1236_v62  ;;  %v1056_v12 = vpack.c.bf16 %v1048_v9, %v1048_v9 }
 0x248   : > { %v1234_v4 = vpop.permute.xlu0 %1233  ;;  %v1393_v61 = vunpack.c.l.b16 %v1326_v57 }
 0x249   : > { %v1323_v25 = vsel %vm912_vm3, %v4199_v32, %v1234_v4  ;;  %v1329_v32 = vsel %vm912_vm3, %v4223_v54, %v1238_v39  ;;  %v1244_v19 = vpop.permute.xlu2 %1243 }
 0x24a   : > { %v1388_v56 = vunpack.c.l.b16 %v1323_v25  ;;  %v1398_v35 = vunpack.c.l.b16 %v1329_v32  ;;  %v1338_v48 = vsel %vm912_vm3, %v4243_v13, %v1244_v19 }
 0x24c   : > { %v1503_v33 = vpack.c.b16 %v1393_v61, %v1388_v56  ;;  %v4493_v61 = vld [vmem:[%s4934_s4] ss:$0 sm:$0xff] }
 0x24e   : > { %1840 = vmatmul.bf16.gmra.mxu2 %v1512_v52  ;;  %v1242_v58 = vpop.permute.xlu1 %1241  ;;  %v4456_v52 = vunpack.c.l.b16 %v1088_v51 }
 0x250   : > { %v1240_v44 = vpop.permute.xlu0 %1239 }
 0x251   : > { %v1332_v6 = vsel %vm912_vm3, %v4240_v7, %v1240_v44  ;;  %v1335_v7 = vsel %vm912_vm3, %v4231_v29, %v1242_v58  ;;  %v1942_v44 = vld [vmem:[#allocation2 + $0x1] sm:$0xff] }
 0x252   : > { %v4423_v24 = vpop.f32.mrf.mxu2  ;;  %v1403_v20 = vunpack.c.l.b16 %v1332_v6  ;;  %v1408_v16 = vunpack.c.l.b16 %v1335_v7  ;;  %v1950_v39 = vpack.c.bf16 %v1942_v44, %v1942_v44  ;;  %v3592_v6 = vld [vmem:[%s4935_s5 + $0x110] sm:$0xff]  ;;  %v3591_v7 = vld [vmem:[%s4935_s5 + $0x108] sm:$0xff] }
 0x253   : > { %2866 = vmatpush.bf16.msrb.mxu0 %v3592_v6 }
 0x254   : > { %v1508_v2 = vpack.c.b16 %v1403_v20, %v1398_v35  ;;  %v2078_v35 = vunpack.c.l.b16 %v1950_v39 }
 0x256   : > { %1816 = vmatmul.bf16.gmra.mxu3 %v1516_v5  ;;  %v1248_v49 = vpop.permute.xlu1 %1247  ;;  %v2086_v58 = vpack.c.b16 %v2078_v35, %v2078_v35 }
 0x257   : > { %v1344_v29 = vsel %vm912_vm3, %v1056_v12, %v1248_v49  ;;  %2867 = vmatpush.bf16.msrb.mxu0 %v3591_v7 }
 0x258   : > { %v1246_v60 = vpop.permute.xlu0 %1245  ;;  %2094 = vrot.lane.b32.xlu2 %v2086_v58, %s3716_s8 }
 0x259   : > { %v1341_v45 = vsel %vm912_vm3, %v4263_v47, %v1246_v60  ;;  %v1519_v47 = vpack.c.b16 %v4456_v52, %v4254_v43  ;;  %v3588_v43 = vld [vmem:[%s4935_s5 + $0xf0] sm:$0xff] }
 0x25a   : > { %v4433_v3 = vpop.f32.mrf.mxu2  ;;  %v1418_v13 = vunpack.c.l.b16 %v1341_v45  ;;  %2833 = vmatpush.bf16.msrb.mxu1 %v3588_v43 }
 0x25e   : > { %1845 = vmatmul.bf16.gmra.mxu2 %v1517_v18 }
 0x266   : > { %1859 = vmatmul.bf16.vlgmr.msrb.gmra.mxu3 %v1503_v33  ;;  %v3587_v33 = vld [vmem:[%s4935_s5 + $0xe8] sm:$0xff] }
 0x267   : > { %2834 = vmatpush.bf16.msrb.mxu1 %v3587_v33 }
 0x26e   : > { %3323 = vmatmul.msk.bf16.vlgmr.msrb.gmra.mxu2 %vm912_vm3, %v1504_v30  ;;  %v1413_v30 = vunpack.c.l.b16 %v1338_v48 }
 0x270   : > { %v1513_v54 = vpack.c.b16 %v1413_v30, %v1408_v16  ;;  %v3590_v30 = vld [vmem:[%s4935_s5 + $0x100] sm:$0xff] }
 0x271   : > { %v4435_v14 = vpop.f32.mrf.mxu2  ;;  %2868 = vmatpush.bf16.msrb.mxu0 %v3590_v30 }
 0x272   : > { %v1779_v40 = vadd.f32 %v4493_v61, %v4435_v14 }
 0x276   : > { %1864 = vmatmul.bf16.gmra.mxu3 %v1508_v2  ;;  %v1774_v2 = vadd.f32 %v4493_v61, %v4423_v24  ;;  %v1776_v24 = vadd.f32 %v4493_v61, %v4433_v3 }
 0x279   : > { %v4445_v63 = vpop.f32.mrf.mxu2 }
 0x27a   : > { %v1781_v55 = vadd.f32 %v4493_v61, %v4445_v63 }
 0x27e   : > { %3324 = vmatmul.msk.bf16.gmra.mxu2 %vm912_vm3, %v1509_v34  ;;  %v1423_v34 = vunpack.c.l.b16 %v1344_v29 }
 0x280   : > { %v1518_v50 = vpack.c.b16 %v1423_v34, %v1418_v13 }
 0x281   : > { %v4454_v31 = vpop.f32.mrf.mxu2 }
 0x286   : > { %1869 = vmatmul.bf16.gmra.mxu3 %v1513_v54 }
 0x289   : > { %v4458_v46 = vpop.f32.mrf.mxu2 }
 0x28e   : > { %3325 = vmatmul.msk.bf16.gmra.mxu2 %vm912_vm3, %v1514_v36 }
 0x296   : > { %1874 = vmatmul.bf16.gmra.mxu3 %v1518_v50 }
 0x29e   : > { %3326 = vmatmul.msk.bf16.gmra.mxu2 %vm912_vm3, %v1519_v47 }
 0x2a1   : > { %v4463_v42 = vpop.f32.mrf.mxu2 }
 0x2a9   : > { %v4468_v36 = vpop.f32.mrf.mxu2  ;;  %v1802_v53 = vpop.f32.mrf.mxu3 }
 0x2aa   : > { %v1803_v19 = vadd.f32 %v1802_v53, %v1774_v2 }
 0x2b1   : > { %v1804_v23 = vpop.f32.mrf.mxu3  ;;  %v1831_v11 = vpop.f32.mrf.mxu2 }
 0x2b2   : > { %v1832_v48 = vadd.f32 %v1831_v11, %v1803_v19  ;;  %v1805_v49 = vadd.f32 %v1804_v23, %v1776_v24  ;;  %v1784_v19 = vadd.f32 %v4493_v61, %v4454_v31 }
 0x2b9   : > { %v1807_v10 = vpop.f32.mrf.mxu3  ;;  %v1833_v38 = vpop.f32.mrf.mxu2 }
 0x2ba   : > { %v1834_v29 = vadd.f32 %v1833_v38, %v1805_v49  ;;  %v1808_v51 = vadd.f32 %v1807_v10, %v1779_v40 }
 0x2c1   : > { %v1809_v5 = vpop.f32.mrf.mxu3  ;;  %v1836_v8 = vpop.f32.mrf.mxu2 }
 0x2c2   : > { %v1837_v53 = vadd.f32 %v1836_v8, %v1808_v51  ;;  %v1810_v14 = vadd.f32 %v1809_v5, %v1781_v55  ;;  %v1789_v55 = vadd.f32 %v4493_v61, %v4463_v42 }
 0x2c9   : > { %v4476_v59 = vpop.f32.mrf.mxu3  ;;  %v1838_v1 = vpop.f32.mrf.mxu2 }
 0x2ca   : > { %v1839_v8 = vadd.f32 %v1838_v1, %v1810_v14 }
 0x2d1   : > { %v4478_v4 = vpop.f32.mrf.mxu3  ;;  %v4480_v62 = vpop.f32.mrf.mxu2 }
 0x2d9   : > { %v4482_v18 = vpop.f32.mrf.mxu3  ;;  %v4484_v25 = vpop.f32.mrf.mxu2 }
 0x2e1   : > { %v4486_v57 = vpop.f32.mrf.mxu3  ;;  %v4488_v56 = vpop.f32.mrf.mxu2 }
 0x2e9   : > { %v4501_v32 = vpop.f32.mrf.mxu2  ;;  %v1860_v20 = vpop.f32.mrf.mxu3 }
 0x2ea   : > { %v1861_v16 = vadd.f32 %v1860_v20, %v1832_v48  ;;  %v3586_v20 = vld [vmem:[%s4935_s5 + $0xe0] sm:$0xff]  ;;  %v1813_v48 = vadd.f32 %v4476_v59, %v1784_v19 }
 0x2eb   : > { %2835 = vmatpush.bf16.msrb.mxu1 %v3586_v20 }
 0x2ec   : > { %v1842_v24 = vadd.f32 %v4480_v62, %v1813_v48  ;;  %v1786_v62 = vadd.f32 %v4493_v61, %v4458_v46  ;;  %v1791_v48 = vadd.f32 %v4493_v61, %v4468_v36  ;;  %v3563_v36 = vld [vmem:[%s4935_s5 + $0x28] sm:$0xff] }
 0x2ee   : > { %v1815_v51 = vadd.f32 %v4478_v4, %v1786_v62 }
 0x2f0   : > { %v1844_v46 = vadd.f32 %v4484_v25, %v1815_v51 }
 0x2f1   : > { %v1862_v54 = vpop.f32.mrf.mxu3  ;;  %v1889_v9 = vpop.f32.mrf.mxu2 }
 0x2f2   : > { %v1890_v12 = vadd.f32 %v1889_v9, %v1861_v16  ;;  %v1863_v45 = vadd.f32 %v1862_v54, %v1834_v29 }
 0x2f4   : > { %v1909_v60 = vmax.f32 %v1890_v12, 0.0 }
 0x2f6   : > { %1917 = vst.msk [vmem:[#allocation2 + $0x11] sm:$0xff] %vm912_vm3, %v1909_v60 }
 0x2f9   : > { %v1865_v34 = vpop.f32.mrf.mxu3  ;;  %v1891_v13 = vpop.f32.mrf.mxu2 }
 0x2fa   : > { %v1892_v50 = vadd.f32 %v1891_v13, %v1863_v45  ;;  %v1866_v23 = vadd.f32 %v1865_v34, %v1837_v53  ;;  %v3565_v53 = vld [vmem:[%s4935_s5 + $0x38] sm:$0xff] }
 0x2fb   : > { %2745 = vmatpush.bf16.msra.mxu3 %v3565_v53 }
 0x2fc   : > { %v1910_v47 = vmax.f32 %v1892_v50, 0.0 }
 0x2fd   : > { %v1943_v15 = vld [vmem:[#allocation2 + $0x11] sm:$0xff] }
 0x2fe   : > { %1918 = vst.msk [vmem:[#allocation2 + $0x21] sm:$0xff] %vm912_vm3, %v1910_v47  ;;  %v4518_v3 = vpack.c.bf16 %v1943_v15, %v1943_v15 }
 0x300   : > { %v2079_v11 = vunpack.c.l.b16 %v4518_v3 }
 0x301   : > { %v1867_v38 = vpop.f32.mrf.mxu3  ;;  %v1894_v43 = vpop.f32.mrf.mxu2 }
 0x302   : > { %v1895_v33 = vadd.f32 %v1894_v43, %v1866_v23  ;;  %v2087_v44 = vpack.c.b16 %v2079_v11, %v2079_v11  ;;  %v1868_v35 = vadd.f32 %v1867_v38, %v1839_v8 }
 0x304   : > { %v1911_v39 = vmax.f32 %v1895_v33, 0.0  ;;  %2096 = vrot.lane.b32.xlu0 %v2087_v44, %s3716_s8 }
 0x305   : > { %v1944_v10 = vld [vmem:[#allocation2 + $0x21] sm:$0xff] }
 0x306   : > { %1919 = vst.msk [vmem:[#allocation2 + $0x31] sm:$0xff] %vm912_vm3, %v1911_v39  ;;  %v4525_v6 = vpack.c.bf16 %v1944_v10, %v1944_v10  ;;  %v2054_v5 = vld [vmem:[#allocation2 + $0x22] sm:$0xff]  ;;  %v1818_v39 = vadd.f32 %v4482_v18, %v1789_v55  ;;  %v3585_v18 = vld [vmem:[%s4935_s5 + $0xd8] sm:$0xff] }
 0x307   : > { %v4538_v30 = vpack.c.bf16 %v2054_v5, %v2054_v5  ;;  %2836 = vmatpush.bf16.msrb.mxu1 %v3585_v18 }
 0x308   : > { %v2080_v2 = vunpack.c.l.b16 %v4525_v6  ;;  %v1847_v42 = vadd.f32 %v4488_v56, %v1818_v39 }
 0x309   : > { %v1870_v63 = vpop.f32.mrf.mxu3  ;;  %v1896_v58 = vpop.f32.mrf.mxu2  ;;  %v4548_v59 = vunpack.c.l.b16 %v4538_v30 }
 0x30a   : > { %v1897_v7 = vadd.f32 %v1896_v58, %v1868_v35  ;;  %v4533_v1 = vpack.c.b16 %v2080_v2, %v2080_v2  ;;  %v1871_v49 = vadd.f32 %v1870_v63, %v1842_v24  ;;  %v3564_v35 = vld [vmem:[%s4935_s5 + $0x30] sm:$0xff] }
 0x30b   : > { %v1974_v58 = vld [vmem:[#allocation2 + $0x10] sm:$0xff]  ;;  %2746 = vmatpush.bf16.msra.mxu3 %v3564_v35 }
 0x30c   : > { %v1912_v16 = vmax.f32 %v1897_v7, 0.0  ;;  %2098 = vrot.lane.b32.xlu1 %v4533_v1, %s3716_s8 }
 0x30d   : > { %v1945_v54 = vld [vmem:[#allocation2 + $0x31] sm:$0xff] }
 0x30e   : > { %v2055_v9 = vld [vmem:[#allocation2 + $0x32] sm:$0xff]  ;;  %1920 = vst.msk [vmem:[#allocation2 + $0x41] sm:$0xff] %vm912_vm3, %v1912_v16  ;;  %v4542_v12 = vpack.c.bf16 %v1945_v54, %v1945_v54 }
 0x30f   : > { %v4544_v31 = vpack.c.bf16 %v2055_v9, %v2055_v9  ;;  %2747 = vmatpush.bf16.msra.mxu3 %v3563_v36  ;;  %v1976_v18 = vld [vmem:[#allocation2 + $0x30] sm:$0xff] }
 0x310   : > { %v2081_v60 = vunpack.c.l.b16 %v4542_v12 }
 0x311   : > { %v4551_v29 = vunpack.c.l.b16 %v4544_v31  ;;  %v1872_v45 = vpop.f32.mrf.mxu3  ;;  %v1899_v34 = vpop.f32.mrf.mxu2 }
 0x312   : > { %v1900_v13 = vadd.f32 %v1899_v34, %v1871_v49  ;;  %v4555_v40 = vpack.c.b16 %v2081_v60, %v2081_v60  ;;  %v1873_v11 = vadd.f32 %v1872_v45, %v1844_v46  ;;  %v4605_v49 = vpack.c.bf16 %v1974_v58, %v1974_v58  ;;  %v2006_v58 = vld [vmem:[#allocation2 + $0x12] sm:$0xff] }
 0x313   : > { %v2485_v50 = vpack.c.b16 %v4551_v29, %v4548_v59  ;;  %v1820_v60 = vadd.f32 %v4486_v57, %v1791_v48 }
 0x314   : > { %v1913_v47 = vmax.f32 %v1900_v13, 0.0  ;;  %2100 = vrot.lane.b32.xlu2 %v4555_v40, %s3716_s8  ;;  %v2118_v57 = vunpack.c.l.b16 %v4605_v49 }
 0x315   : > { %3471 = vmatmul.msk.bf16.vlgmr.msrb.gmra.mxu0 %vm912_vm3, %v2485_v50  ;;  %v1946_v15 = vld [vmem:[#allocation2 + $0x41] sm:$0xff]  ;;  %v1849_v61 = vadd.f32 %v4501_v32, %v1820_v60  ;;  %v3561_v60 = vld [vmem:[%s4935_s5 + $0x18] sm:$0xff] }
 0x316   : > { %1921 = vst.msk [vmem:[#allocation2 + $0x51] sm:$0xff] %vm912_vm3, %v1913_v47  ;;  %v4568_v23 = vpack.c.bf16 %v1946_v15, %v1946_v15  ;;  %v2056_v43 = vld [vmem:[#allocation2 + $0x42] sm:$0xff] }
 0x317   : > { %v4578_v10 = vpack.c.bf16 %v2056_v43, %v2056_v43  ;;  %v1975_v50 = vld [vmem:[#allocation2 + $0x20] sm:$0xff] }
 0x318   : > { %v2082_v4 = vunpack.c.l.b16 %v4568_v23 }
 0x319   : > { %v1901_v38 = vpop.f32.mrf.mxu2  ;;  %v1875_v14 = vpop.f32.mrf.mxu3  ;;  %v4593_v19 = vunpack.c.l.b16 %v4578_v10 }
 0x31a   : > { %v1902_v33 = vadd.f32 %v1901_v38, %v1873_v11  ;;  %v4573_v44 = vpack.c.b16 %v2082_v4, %v2082_v4  ;;  %v1876_v5 = vadd.f32 %v1875_v14, %v1847_v42  ;;  %v2126_v4 = vpack.c.b16 %v2118_v57, %v2118_v57  ;;  %v3562_v14 = vld [vmem:[%s4935_s5 + $0x20] sm:$0xff] }
 0x31b   : > { %v4622_v38 = vpack.c.bf16 %v1975_v50, %v1975_v50  ;;  %2748 = vmatpush.bf16.msra.mxu3 %v3562_v14 }
 0x31c   : > { %v1914_v25 = vmax.f32 %v1902_v33, 0.0  ;;  %2102 = vrot.lane.b32.xlu0 %v4573_v44, %s3716_s8 }
 0x31d   : > { %v2057_v8 = vld [vmem:[#allocation2 + $0x52] sm:$0xff] }
 0x31e   : > { %v1947_v20 = vld [vmem:[#allocation2 + $0x51] sm:$0xff]  ;;  %1922 = vst.msk [vmem:[#allocation2 + $0x61] sm:$0xff] %vm912_vm3, %v1914_v25  ;;  %v4585_v2 = vpack.c.bf16 %v2057_v8, %v2057_v8  ;;  %v2119_v25 = vunpack.c.l.b16 %v4622_v38 }
 0x31f   : > { %v4587_v63 = vpack.c.bf16 %v1947_v20, %v1947_v20  ;;  %2749 = vmatpush.bf16.msra.mxu3 %v3561_v60 }
 0x320   : > { %v4596_v7 = vunpack.c.l.b16 %v4585_v2 }
 0x321   : > { %v2083_v56 = vunpack.c.l.b16 %v4587_v63  ;;  %v1904_v16 = vpop.f32.mrf.mxu2  ;;  %v1877_v34 = vpop.f32.mrf.mxu3 }
 0x322   : > { %v1905_v54 = vadd.f32 %v1904_v16, %v1876_v5  ;;  %v2490_v9 = vpack.c.b16 %v4596_v7, %v4593_v19  ;;  %v1878_v51 = vadd.f32 %v1877_v34, %v1849_v61  ;;  %v2167_v16 = vpack.c.b16 %v4548_v59, %v4548_v59 }
 0x323   : > { %v4603_v24 = vpack.c.b16 %v2083_v56, %v2083_v56  ;;  %v2127_v56 = vpack.c.b16 %v2119_v25, %v2119_v25 }
 0x324   : > { %v1915_v45 = vmax.f32 %v1905_v54, 0.0  ;;  %v4648_v54 = vpack.c.bf16 %v1976_v18, %v1976_v18 }
 0x325   : > { %3472 = vmatmul.msk.bf16.gmra.mxu0 %vm912_vm3, %v2490_v9  ;;  %2104 = vrot.lane.b32.xlu1 %v4603_v24, %s3716_s8  ;;  %v1948_v62 = vld [vmem:[#allocation2 + $0x61] sm:$0xff]  ;;  %v4650_v9 = vpack.c.bf16 %v2006_v58, %v2006_v58 }
 0x326   : > { %1923 = vst.msk [vmem:[#allocation2 + $0x71] sm:$0xff] %vm912_vm3, %v1915_v45  ;;  %v4616_v13 = vpack.c.bf16 %v1948_v62, %v1948_v62  ;;  %v2058_v53 = vld [vmem:[#allocation2 + $0x62] sm:$0xff]  ;;  %v2120_v45 = vunpack.c.l.b16 %v4648_v54 }
 0x327   : > { %v4627_v43 = vpack.c.bf16 %v2058_v53, %v2058_v53  ;;  %v2158_v59 = vunpack.c.l.b16 %v4650_v9  ;;  %v1977_v62 = vld [vmem:[#allocation2 + $0x40] sm:$0xff] }
 0x328   : > { %v2084_v47 = vunpack.c.l.b16 %v4616_v13  ;;  %v4662_v61 = vpack.c.bf16 %v1977_v62, %v1977_v62  ;;  %v2128_v57 = vpack.c.b16 %v2120_v45, %v2120_v45  ;;  %v1979_v14 = vld [vmem:[#allocation2 + $0x60] sm:$0xff]  ;;  %v3573_v45 = vld [vmem:[%s4935_s5 + $0x78] sm:$0xff] }
 0x329   : > { %v1906_v15 = vpop.f32.mrf.mxu2  ;;  %v2390_v20 = vunpack.c.l.b16 %v4627_v43  ;;  %v2166_v50 = vpack.c.b16 %v2158_v59, %v2158_v59  ;;  %v3558_v58 = vld [vmem:[%s4935_s5] sm:$0xff]  ;;  %2774 = vmatpush.bf16.msra.mxu2 %v3573_v45 }
 0x32a   : > { %v1907_v46 = vadd.f32 %v1906_v15, %v1878_v51  ;;  %v4620_v11 = vpack.c.b16 %v2084_v47, %v2084_v47  ;;  %v3560_v51 = vld [vmem:[%s4935_s5 + $0x10] sm:$0xff]  ;;  %v2121_v53 = vunpack.c.l.b16 %v4662_v61 }
 0x32b   : > { %v3584_v47 = vld [vmem:[%s4935_s5 + $0xd0] sm:$0xff]  ;;  %2750 = vmatpush.bf16.msra.mxu3 %v3560_v51 }
 0x32c   : > { %v1916_v32 = vmax.f32 %v1907_v46, 0.0  ;;  %2106 = vrot.lane.b32.xlu2 %v4620_v11, %s3716_s8  ;;  %2837 = vmatpush.bf16.msrb.mxu1 %v3584_v47  ;;  %v1978_v46 = vld [vmem:[#allocation2 + $0x50] sm:$0xff] }
 0x32d   : > { %2134 = vrot.lane.b32.xlu1 %v2126_v4, %s3716_s8  ;;  %v2059_v55 = vld [vmem:[#allocation2 + $0x72] sm:$0xff]  ;;  %v2129_v4 = vpack.c.b16 %v2121_v53, %v2121_v53 }
 0x32e   : > { %v1949_v33 = vld [vmem:[#allocation2 + $0x71] sm:$0xff]  ;;  %1924 = vst.msk [vmem:[#allocation2 + $0x81] sm:$0xff] %vm912_vm3, %v1916_v32  ;;  %v4633_v39 = vpack.c.bf16 %v2059_v55, %v2059_v55  ;;  %v2169_v32 = vpack.c.b16 %v4593_v19, %v4593_v19  ;;  %v4678_v55 = vpack.c.bf16 %v1978_v46, %v1978_v46  ;;  %v4689_v19 = vpack.c.bf16 %v1979_v14, %v1979_v14  ;;  %v3571_v46 = vld [vmem:[%s4935_s5 + $0x68] sm:$0xff]  ;;  %v3570_v14 = vld [vmem:[%s4935_s5 + $0x60] sm:$0xff] }
 0x32f   : > { %v4636_v8 = vpack.c.bf16 %v1949_v33, %v1949_v33  ;;  %v3559_v33 = vld [vmem:[%s4935_s5 + $0x8] sm:$0xff]  ;;  %v1980_v18 = vld [vmem:[#allocation2 + $0x70] sm:$0xff] }
 0x330   : > { %v4640_v35 = vunpack.c.l.b16 %v4633_v39  ;;  %2751 = vmatpush.bf16.msra.mxu3 %v3559_v33  ;;  %v2045_v53 = vld [vmem:[#allocation2 + $0x91] sm:$0xff] }
 0x331   : > { %v2085_v42 = vunpack.c.l.b16 %v4636_v8 }
 0x332   : > { %v2495_v5 = vpack.c.b16 %v4640_v35, %v2390_v20 }
 0x333   : > { %v4644_v48 = vpack.c.b16 %v2085_v42, %v2085_v42  ;;  %v2168_v42 = vpack.c.b16 %v4551_v29, %v4551_v29 }
 0x334   : > { %2136 = vrot.lane.b32.xlu2 %v2127_v56, %s3716_s8  ;;  %2752 = vmatpush.bf16.msra.mxu3 %v3558_v58  ;;  %v2171_v56 = vpack.c.b16 %v2390_v20, %v2390_v20  ;;  %v2170_v20 = vpack.c.b16 %v4596_v7, %v4596_v7  ;;  %v3572_v7 = vld [vmem:[%s4935_s5 + $0x70] sm:$0xff] }
 0x335   : > { %3473 = vmatmul.msk.bf16.gmra.mxu0 %vm912_vm3, %v2495_v5  ;;  %2176 = vrot.lane.b32.xlu1 %v2167_v16, %s3716_s8  ;;  %v2060_v34 = vld [vmem:[#allocation2 + $0x82] sm:$0xff]  ;;  %v4701_v16 = vpack.c.bf16 %v1980_v18, %v1980_v18 }
 0x336   : > { %2108 = vrot.lane.b32.xlu0 %v4644_v48, %s3716_s8  ;;  %v2068_v36 = vpack.c.bf16 %v2060_v34, %v2060_v34  ;;  %v2044_v62 = vld [vmem:[#allocation2 + $0x81] sm:$0xff]  ;;  %2775 = vmatpush.bf16.msra.mxu2 %v3572_v7  ;;  %v3576_v7 = vld [vmem:[%s4935_s5 + $0x90] sm:$0xff] }
 0x337   : > { %v2124_v29 = vunpack.c.l.b16 %v4701_v16 }
 0x338   : > { %v2400_v15 = vunpack.c.l.b16 %v2068_v36  ;;  %v3583_v36 = vld [vmem:[%s4935_s5 + $0xc8] sm:$0xff] }
 0x339   : > { %v2132_v59 = vpack.c.b16 %v2124_v29, %v2124_v29  ;;  %2838 = vmatpush.bf16.msrb.mxu1 %v3583_v36 }
 0x33a   : > { %v2173_v51 = vpack.c.b16 %v2400_v15, %v2400_v15  ;;  %2776 = vmatpush.bf16.msra.mxu2 %v3571_v46  ;;  %v3575_v46 = vld [vmem:[%s4935_s5 + $0x88] sm:$0xff] }
 0x33c   : > { %2214 = vrot.lane.b32.xlu2 %v4533_v1, %s3716_s8  ;;  %v2500_v1 = vpack.c.b16 %v4456_v52, %v2400_v15  ;;  %v2122_v52 = vunpack.c.l.b16 %v4678_v55  ;;  %v2172_v15 = vpack.c.b16 %v4640_v35, %v4640_v35  ;;  %v3578_v35 = vld [vmem:[%s4935_s5 + $0xa0] sm:$0xff] }
 0x33d   : > { %2138 = vrot.lane.b32.xlu1 %v2128_v57, %s3716_s8 }
 0x33e   : > { %2174 = vrot.lane.b32.xlu0 %v2166_v50, %s3716_s8  ;;  %v2130_v25 = vpack.c.b16 %v2122_v52, %v2122_v52  ;;  %v4732_v50 = vpack.c.bf16 %v2044_v62, %v2044_v62  ;;  %2777 = vmatpush.bf16.msra.mxu2 %v3570_v14 }
 0x340   : > { %v2204_v47 = vunpack.c.l.b16 %v4732_v50 }
 0x344   : > { %2140 = vrot.lane.b32.xlu2 %v2129_v4, %s3716_s8  ;;  %v2212_v4 = vpack.c.b16 %v2204_v47, %v2204_v47 }
 0x345   : > { %3474 = vmatmul.msk.bf16.gmra.mxu0 %vm912_vm3, %v2500_v1  ;;  %2180 = vrot.lane.b32.xlu1 %v2169_v32, %s3716_s8  ;;  %v2053_v1 = vpack.c.bf16 %v2045_v53, %v2045_v53  ;;  %v1926_v32 = vld [vmem:[#allocation2] sm:$0xff] }
 0x346   : > { %2216 = vrot.lane.b32.xlu0 %v4555_v40, %s3716_s8  ;;  %v2123_v40 = vunpack.c.l.b16 %v4689_v19  ;;  %v1934_v52 = vpack.c.bf16 %v1926_v32, %v1926_v32  ;;  %v3574_v32 = vld [vmem:[%s4935_s5 + $0x80] sm:$0xff] }
 0x347   : > { %v2205_v33 = vunpack.c.l.b16 %v2053_v1 }
 0x348   : > { %v2131_v5 = vpack.c.b16 %v2123_v40, %v2123_v40  ;;  %v3569_v40 = vld [vmem:[%s4935_s5 + $0x58] sm:$0xff] }
 0x349   : > { %2778 = vmatpush.bf16.msra.mxu2 %v3569_v40 }
 0x34c   : > { %2218 = vrot.lane.b32.xlu2 %v4573_v44, %s3716_s8  ;;  %v1981_v44 = vld [vmem:[#allocation2 + $0x80] sm:$0xff] }
 0x34d   : > { %2142 = vrot.lane.b32.xlu1 %v2130_v25, %s3716_s8  ;;  %v4708_v60 = vpack.c.bf16 %v1981_v44, %v1981_v44  ;;  %v2213_v25 = vpack.c.b16 %v2205_v33, %v2205_v33  ;;  %v3568_v44 = vld [vmem:[%s4935_s5 + $0x50] sm:$0xff] }
 0x34e   : > { %2178 = vrot.lane.b32.xlu0 %v2168_v42, %s3716_s8  ;;  %v2095_v42 = vpop.permute.xlu2 %2094  ;;  %2779 = vmatpush.bf16.msra.mxu2 %v3568_v44 }
 0x34f   : > { %v2125_v34 = vunpack.c.l.b16 %v4708_v60  ;;  %v2232_v18 = vsel %vm912_vm3, %v1934_v52, %v2095_v42 }
 0x350   : > { %v2366_v58 = vunpack.c.l.b16 %v2232_v18 }
 0x351   : > { %v2133_v57 = vpack.c.b16 %v2125_v34, %v2125_v34  ;;  %v3566_v34 = vld [vmem:[%s4935_s5 + $0x40] sm:$0xff] }
 0x354   : > { %2144 = vrot.lane.b32.xlu2 %v2131_v5, %s3716_s8 }
 0x355   : > { %2184 = vrot.lane.b32.xlu1 %v2171_v56, %s3716_s8 }
 0x356   : > { %2220 = vrot.lane.b32.xlu0 %v4603_v24, %s3716_s8  ;;  %v3581_v24 = vld [vmem:[%s4935_s5 + $0xb8] sm:$0xff] }
 0x357   : > { %2803 = vmatpush.bf16.msrb.mxu3 %v3581_v24 }
 0x35c   : > { %2222 = vrot.lane.b32.xlu2 %v4620_v11, %s3716_s8  ;;  %v3580_v11 = vld [vmem:[%s4935_s5 + $0xb0] sm:$0xff] }
 0x35d   : > { %2146 = vrot.lane.b32.xlu1 %v2132_v59, %s3716_s8  ;;  %2804 = vmatpush.bf16.msrb.mxu3 %v3580_v11  ;;  %v3577_v59 = vld [vmem:[%s4935_s5 + $0x98] sm:$0xff]  ;;  %v3582_v11 = vld [vmem:[%s4935_s5 + $0xc0] sm:$0xff] }
 0x35e   : > { %2182 = vrot.lane.b32.xlu0 %v2170_v20, %s3716_s8  ;;  %v3567_v20 = vld [vmem:[%s4935_s5 + $0x48] sm:$0xff]  ;;  %2839 = vmatpush.bf16.msrb.mxu1 %v3582_v11 }
 0x35f   : > { %2780 = vmatpush.bf16.msra.mxu2 %v3567_v20 }
 0x363   : > { %2781 = vmatpush.bf16.msra.mxu2 %v3566_v34 }
 0x364   : > { %2148 = vrot.lane.b32.xlu2 %v2133_v57, %s3716_s8 }
 0x365   : > { %2188 = vrot.lane.b32.xlu1 %v2173_v51, %s3716_s8 }
 0x366   : > { %2224 = vrot.lane.b32.xlu0 %v4644_v48, %s3716_s8  ;;  %v3579_v48 = vld [vmem:[%s4935_s5 + $0xa8] sm:$0xff] }
 0x367   : > { %2805 = vmatpush.bf16.msrb.mxu3 %v3579_v48 }
 0x36b   : > { %2806 = vmatpush.bf16.msrb.mxu3 %v3578_v35  ;;  %v1958_v35 = vld [vmem:[#allocation2 + $0x2] sm:$0xff] }
 0x36c   : > { %2226 = vrot.lane.b32.xlu2 %v2212_v4, %s3716_s8  ;;  %v1966_v40 = vpack.c.bf16 %v1958_v35, %v1958_v35 }
 0x36e   : > { %2186 = vrot.lane.b32.xlu0 %v2172_v15, %s3716_s8  ;;  %v2101_v24 = vpop.permute.xlu2 %2100 }
 0x36f   : > { %2807 = vmatpush.bf16.msrb.mxu3 %v3577_v59  ;;  %v2241_v36 = vsel %vm912_vm3, %v4648_v54, %v2101_v24 }
 0x370   : > { %v2381_v47 = vunpack.c.l.b16 %v2241_v36 }
 0x373   : > { %2808 = vmatpush.bf16.msrb.mxu3 %v3576_v7 }
 0x376   : > { %2228 = vrot.lane.b32.xlu0 %v2213_v25, %s3716_s8  ;;  %v2097_v5 = vpop.permute.xlu0 %2096  ;;  %s2996_s8 = sshll.u32 %s269_s17, 6 }
 0x377   : > { %v2235_v56 = vsel %vm912_vm3, %v4605_v49, %v2097_v5  ;;  %2809 = vmatpush.bf16.msrb.mxu3 %v3575_v46  ;;  %s4862_s18 = scalar_lea.vmem [#allocation3], %s2996_s8 }
 0x378   : > { %v2371_v29 = vunpack.c.l.b16 %v2235_v56  ;;  %s2927_s23 = sshll.u32 %s4862_s18, 4  ;;  %s2928_s23 = int_to_ptr.vmem [resolvable:$true] %s2927_s23 }
 0x37a   : > { %v2481_v45 = vpack.c.b16 %v2371_v29, %v2366_v58 }
 0x37b   : > { %2810 = vmatpush.bf16.msrb.mxu3 %v3574_v32 }
 0x37c   : > { %2753 = vmatmul.bf16.vlgmr.msra.gmra.mxu3 %v2481_v45 }
 0x37e   : > { %v2099_v49 = vpop.permute.xlu1 %2098 }
 0x37f   : > { %v2238_v62 = vsel %vm912_vm3, %v4622_v38, %v2099_v49 }
 0x380   : > { %v2376_v57 = vunpack.c.l.b16 %v2238_v62 }
 0x382   : > { %v2486_v53 = vpack.c.b16 %v2381_v47, %v2376_v57 }
 0x386   : > { %v2107_v51 = vpop.permute.xlu2 %2106 }
 0x387   : > { %v2250_v59 = vsel %vm912_vm3, %v4689_v19, %v2107_v51 }
 0x388   : > { %v2396_v34 = vunpack.c.l.b16 %v2250_v59 }
 0x38c   : > { %2758 = vmatmul.bf16.gmra.mxu3 %v2486_v53 }
 0x38e   : > { %v2137_v1 = vpop.permute.xlu2 %2136  ;;  %v2103_v4 = vpop.permute.xlu0 %2102 }
 0x38f   : > { %v2244_v15 = vsel %vm912_vm3, %v4662_v61, %v2103_v4  ;;  %v2259_v18 = vsel %vm912_vm3, %v4650_v9, %v2137_v1 }
 0x390   : > { %v2386_v52 = vunpack.c.l.b16 %v2244_v15  ;;  %v2372_v56 = vunpack.c.l.b16 %v2259_v18 }
 0x396   : > { %v2215_v14 = vpop.permute.xlu2 %2214 }
 0x397   : > { %v2105_v48 = vpop.permute.xlu1 %2104  ;;  %v2304_v4 = vsel %vm912_vm3, %v4622_v38, %v2215_v14 }
 0x398   : > { %v2247_v33 = vsel %vm912_vm3, %v4678_v55, %v2105_v48 }
 0x399   : > { %v2391_v25 = vunpack.c.l.b16 %v2247_v33 }
 0x39b   : > { %v2491_v42 = vpack.c.b16 %v2391_v25, %v2386_v52  ;;  %v2369_v52 = vunpack.c.l.b16 %v2304_v4 }
 0x39d   : > { %2763 = vmatmul.bf16.gmra.mxu3 %v2491_v42 }
 0x39e   : > { %v2141_v44 = vpop.permute.xlu2 %2140 }
 0x39f   : > { %v2135_v58 = vpop.permute.xlu1 %2134  ;;  %v2265_v11 = vsel %vm912_vm3, %v4544_v31, %v2141_v44 }
 0x3a0   : > { %v2256_v5 = vsel %vm912_vm3, %v1966_v40, %v2135_v58  ;;  %v2382_v53 = vunpack.c.l.b16 %v2265_v11 }
 0x3a1   : > { %v2367_v29 = vunpack.c.l.b16 %v2256_v5 }
 0x3a3   : > { %v2482_v45 = vpack.c.b16 %v2372_v56, %v2367_v29 }
 0x3a5   : > { %2782 = vmatmul.bf16.vlgmr.msra.gmra.mxu2 %v2482_v45 }
 0x3a6   : > { %v2219_v9 = vpop.permute.xlu2 %2218 }
 0x3a7   : > { %v2177_v20 = vpop.permute.xlu1 %2176  ;;  %v2310_v29 = vsel %vm912_vm3, %v4662_v61, %v2219_v9 }
 0x3a8   : > { %v2109_v24 = vpop.permute.xlu0 %2108  ;;  %v2283_v15 = vsel %vm912_vm3, %v4525_v6, %v2177_v20  ;;  %v2379_v20 = vunpack.c.l.b16 %v2310_v29 }
 0x3a9   : > { %v2253_v49 = vsel %vm912_vm3, %v4701_v16, %v2109_v24  ;;  %v2373_v25 = vunpack.c.l.b16 %v2283_v15 }
 0x3aa   : > { %v2401_v62 = vunpack.c.l.b16 %v2253_v49 }
 0x3ac   : > { %v2496_v7 = vpack.c.b16 %v2401_v62, %v2396_v34 }
 0x3ae   : > { %2768 = vmatmul.bf16.gmra.mxu3 %v2496_v7  ;;  %v2145_v32 = vpop.permute.xlu2 %2144 }
 0x3af   : > { %v2139_v36 = vpop.permute.xlu1 %2138 }
 0x3b0   : > { %v2175_v57 = vpop.permute.xlu0 %2174  ;;  %v2262_v47 = vsel %vm912_vm3, %v4538_v30, %v2139_v36 }
 0x3b1   : > { %v2377_v51 = vunpack.c.l.b16 %v2262_v47  ;;  %v2280_v1 = vsel %vm912_vm3, %v4518_v3, %v2175_v57  ;;  %v2271_v3 = vsel %vm912_vm3, %v4585_v2, %v2145_v32 }
 0x3b2   : > { %v2368_v31 = vunpack.c.l.b16 %v2280_v1  ;;  %v2392_v18 = vunpack.c.l.b16 %v2271_v3 }
 0x3b3   : > { %v2487_v46 = vpack.c.b16 %v2382_v53, %v2377_v51 }
 0x3b4   : > { %v2483_v42 = vpack.c.b16 %v2373_v25, %v2368_v31  ;;  %v2029_v31 = vld [vmem:[#allocation2 + $0x90] sm:$0xff] }
 0x3b5   : > { %2787 = vmatmul.bf16.gmra.mxu2 %v2487_v46 }
 0x3b6   : > { %v2223_v58 = vpop.permute.xlu2 %2222 }
 0x3b7   : > { %v2181_v48 = vpop.permute.xlu1 %2180  ;;  %v2316_v47 = vsel %vm912_vm3, %v4689_v19, %v2223_v58 }
 0x3b8   : > { %v2217_v33 = vpop.permute.xlu0 %2216  ;;  %v2289_v44 = vsel %vm912_vm3, %v4568_v23, %v2181_v48  ;;  %v2389_v1 = vunpack.c.l.b16 %v2316_v47 }
 0x3b9   : > { %v2307_v30 = vsel %vm912_vm3, %v4648_v54, %v2217_v33  ;;  %v2383_v24 = vunpack.c.l.b16 %v2289_v44 }
 0x3ba   : > { %v2374_v35 = vunpack.c.l.b16 %v2307_v30 }
 0x3bc   : > { %v2484_v40 = vpack.c.b16 %v2374_v35, %v2369_v52 }
 0x3be   : > { %2811 = vmatmul.bf16.vlgmr.msrb.gmra.mxu3 %v2483_v42  ;;  %2840 = vmatmul.bf16.vlgmr.msrb.gmra.mxu1 %v2484_v40  ;;  %v2149_v34 = vpop.permute.xlu2 %2148 }
 0x3bf   : > { %v2143_v38 = vpop.permute.xlu1 %2142 }
 0x3c0   : > { %v2179_v14 = vpop.permute.xlu0 %2178  ;;  %v2268_v6 = vsel %vm912_vm3, %v4578_v10, %v2143_v38 }
 0x3c1   : > { %v2387_v5 = vunpack.c.l.b16 %v2268_v6  ;;  %v2286_v54 = vsel %vm912_vm3, %v4542_v12, %v2179_v14  ;;  %v2277_v12 = vsel %vm912_vm3, %v4633_v39, %v2149_v34 }
 0x3c2   : > { %v2378_v2 = vunpack.c.l.b16 %v2286_v54  ;;  %v2402_v11 = vunpack.c.l.b16 %v2277_v12  ;;  %v2870_v54 = vpop.f32.mrf.mxu0 }
 0x3c3   : > { %v2492_v56 = vpack.c.b16 %v2392_v18, %v2387_v5 }
 0x3c4   : > { %v2488_v62 = vpack.c.b16 %v2383_v24, %v2378_v2  ;;  %v4853_v2 = vld [vmem:[%s4936_s6] ss:$0 sm:$0xff] }
 0x3c5   : > { %2792 = vmatmul.bf16.gmra.mxu2 %v2492_v56 }
 0x3c6   : > { %v2227_v48 = vpop.permute.xlu2 %2226 }
 0x3c7   : > { %v2185_v45 = vpop.permute.xlu1 %2184  ;;  %v2322_v30 = vsel %vm912_vm3, %v4708_v60, %v2227_v48 }
 0x3c8   : > { %v2221_v59 = vpop.permute.xlu0 %2220  ;;  %v2295_v53 = vsel %vm912_vm3, %v4616_v13, %v2185_v45  ;;  %v2037_v13 = vpack.c.bf16 %v2029_v31, %v2029_v31  ;;  %v2399_v42 = vunpack.c.l.b16 %v2322_v30 }
 0x3c9   : > { %v2313_v10 = vsel %vm912_vm3, %v4678_v55, %v2221_v59 }
 0x3ca   : > { %v2384_v49 = vunpack.c.l.b16 %v2313_v10 }
 0x3cc   : > { %v2489_v7 = vpack.c.b16 %v2384_v49, %v2379_v20  ;;  %v2872_v20 = vpop.f32.mrf.mxu0 }
 0x3ce   : > { %2816 = vmatmul.bf16.gmra.mxu3 %v2488_v62  ;;  %2845 = vmatmul.bf16.gmra.mxu1 %v2489_v7 }
 0x3cf   : > { %v2147_v61 = vpop.permute.xlu1 %2146 }
 0x3d0   : > { %v2183_v9 = vpop.permute.xlu0 %2182  ;;  %v2274_v23 = vsel %vm912_vm3, %v4627_v43, %v2147_v61  ;;  %v2393_v43 = vunpack.c.l.b16 %v2295_v53 }
 0x3d1   : > { %v2397_v36 = vunpack.c.l.b16 %v2274_v23  ;;  %v2292_v55 = vsel %vm912_vm3, %v4587_v63, %v2183_v9 }
 0x3d2   : > { %v2388_v51 = vunpack.c.l.b16 %v2292_v55 }
 0x3d3   : > { %v2497_v57 = vpack.c.b16 %v2402_v11, %v2397_v36 }
 0x3d4   : > { %v2493_v15 = vpack.c.b16 %v2393_v43, %v2388_v51  ;;  %v2875_v55 = vpop.f32.mrf.mxu0 }
 0x3d5   : > { %2797 = vmatmul.bf16.gmra.mxu2 %v2497_v57 }
 0x3d7   : > { %v2189_v33 = vpop.permute.xlu1 %2188 }
 0x3d8   : > { %v2225_v39 = vpop.permute.xlu0 %2224 }
 0x3d9   : > { %v2319_v46 = vsel %vm912_vm3, %v4701_v16, %v2225_v39  ;;  %v2301_v16 = vsel %vm912_vm3, %v4732_v50, %v2189_v33 }
 0x3da   : > { %v2394_v4 = vunpack.c.l.b16 %v2319_v46  ;;  %v2403_v40 = vunpack.c.l.b16 %v2301_v16 }
 0x3dc   : > { %v2494_v32 = vpack.c.b16 %v2394_v4, %v2389_v1 }
 0x3de   : > { %2821 = vmatmul.bf16.gmra.mxu3 %v2493_v15  ;;  %2850 = vmatmul.bf16.gmra.mxu1 %v2494_v32 }
 0x3e0   : > { %v2187_v63 = vpop.permute.xlu0 %2186 }
 0x3e1   : > { %v2298_v19 = vsel %vm912_vm3, %v4636_v8, %v2187_v63  ;;  %v2877_v63 = vpop.f32.mrf.mxu0 }
 0x3e2   : > { %v2398_v52 = vunpack.c.l.b16 %v2298_v19 }
 0x3e4   : > { %v2498_v38 = vpack.c.b16 %v2403_v40, %v2398_v52 }
 0x3e8   : > { %v2229_v25 = vpop.permute.xlu0 %2228 }
 0x3e9   : > { %v2325_v35 = vsel %vm912_vm3, %v2037_v13, %v2229_v25  ;;  %v2880_v40 = vpop.f32.mrf.mxu0 }
 0x3ea   : > { %v2404_v3 = vunpack.c.l.b16 %v2325_v35 }
 0x3ec   : > { %v2499_v14 = vpack.c.b16 %v2404_v3, %v2399_v42 }
 0x3ee   : > { %2826 = vmatmul.bf16.gmra.mxu3 %v2498_v38  ;;  %2855 = vmatmul.bf16.gmra.mxu1 %v2499_v14 }
 0x3ff   : > { %v2754_v6 = vpop.f32.mrf.mxu3 }
 0x400   : > { %v2755_v59 = vadd.f32 %v4853_v2, %v2754_v6 }
 0x407   : > { %v2756_v8 = vpop.f32.mrf.mxu3 }
 0x408   : > { %v2757_v12 = vadd.f32 %v4853_v2, %v2756_v8 }
 0x40f   : > { %v2759_v18 = vpop.f32.mrf.mxu3 }
 0x410   : > { %v2760_v39 = vadd.f32 %v4853_v2, %v2759_v18 }
 0x417   : > { %v2761_v58 = vpop.f32.mrf.mxu3 }
 0x418   : > { %v2762_v31 = vadd.f32 %v4853_v2, %v2761_v58 }
 0x420   : > { %v2764_v60 = vpop.f32.mrf.mxu3 }
 0x421   : > { %v2765_v35 = vadd.f32 %v4853_v2, %v2764_v60 }
 0x428   : > { %v4844_v5 = vpop.f32.mrf.mxu3  ;;  %v2783_v50 = vpop.f32.mrf.mxu2 }
 0x429   : > { %v2784_v10 = vadd.f32 %v2783_v50, %v2755_v59  ;;  %v2767_v58 = vadd.f32 %v4853_v2, %v4844_v5 }
 0x430   : > { %v2785_v29 = vpop.f32.mrf.mxu2 }
 0x431   : > { %v4846_v56 = vpop.f32.mrf.mxu3  ;;  %v2786_v9 = vadd.f32 %v2785_v29, %v2757_v12 }
 0x438   : > { %v2788_v34 = vpop.f32.mrf.mxu2 }
 0x439   : > { %v4848_v44 = vpop.f32.mrf.mxu3  ;;  %v2789_v1 = vadd.f32 %v2788_v34, %v2760_v39 }
 0x43b   : > { %v2841_v45 = vpop.f32.mrf.mxu1 }
 0x440   : > { %v2790_v51 = vpop.f32.mrf.mxu2 }
 0x441   : > { %v2812_v24 = vpop.f32.mrf.mxu3  ;;  %v2791_v19 = vadd.f32 %v2790_v51, %v2762_v31 }
 0x442   : > { %v2813_v49 = vadd.f32 %v2812_v24, %v2784_v10 }
 0x443   : > { %v2843_v62 = vpop.f32.mrf.mxu1 }
 0x444   : > { %v2842_v7 = vadd.f32 %v2841_v45, %v2813_v49  ;;  %v2882_v45 = vpop.f32.mrf.mxu0  ;;  %v2770_v49 = vadd.f32 %v4853_v2, %v4846_v56 }
 0x446   : > { %v2871_v61 = vadd.f32 %v2870_v54, %v2842_v7 }
 0x448   : > { %v2890_v23 = vadd.f32 %v2871_v61, %v904_v21  ;;  %v2793_v33 = vpop.f32.mrf.mxu2 }
 0x449   : > { %v2814_v11 = vpop.f32.mrf.mxu3  ;;  %v2794_v3 = vadd.f32 %v2793_v33, %v2765_v35 }
 0x44a   : > { %v2898_v36 = vmax.f32 %v2890_v23, 0.0  ;;  %v2815_v57 = vadd.f32 %v2814_v11, %v2786_v9 }
 0x44b   : > { %v2846_v47 = vpop.f32.mrf.mxu1 }
 0x44c   : > { %2906 = vst.msk [vmem:[%s4862_s18] sm:$0xff] %vm912_vm3, %v2898_v36  ;;  %v2844_v53 = vadd.f32 %v2843_v62, %v2815_v57  ;;  %v2885_v9 = vpop.f32.mrf.mxu0  ;;  %v2772_v36 = vadd.f32 %v4853_v2, %v4848_v44 }
 0x44e   : > { %v2873_v46 = vadd.f32 %v2872_v20, %v2844_v53 }
 0x450   : > { %v2891_v22 = vadd.f32 %v2873_v46, %v4029_v0  ;;  %v2795_v14 = vpop.f32.mrf.mxu2 }
 0x451   : > { %v2817_v21 = vpop.f32.mrf.mxu3  ;;  %v2796_v29 = vadd.f32 %v2795_v14, %v2767_v58 }
 0x452   : > { %v2899_v43 = vmax.f32 %v2891_v22, 0.0  ;;  %v2818_v4 = vadd.f32 %v2817_v21, %v2789_v1 }
 0x453   : > { %v2848_v15 = vpop.f32.mrf.mxu1 }
 0x454   : > { %2907 = vst.msk [vmem:[%s4862_s18 + $0x8] sm:$0xff] %vm912_vm3, %v2899_v43  ;;  %v2847_v32 = vadd.f32 %v2846_v47, %v2818_v4  ;;  %v2887_v44 = vpop.f32.mrf.mxu0 }
 0x456   : > { %v2876_v48 = vadd.f32 %v2875_v55, %v2847_v32 }
 0x458   : > { %v2892_v13 = vadd.f32 %v2876_v48, %v4047_v41  ;;  %v2798_v20 = vpop.f32.mrf.mxu2 }
 0x459   : > { %v2819_v30 = vpop.f32.mrf.mxu3  ;;  %v2799_v5 = vadd.f32 %v2798_v20, %v2770_v49 }
 0x45a   : > { %v2900_v16 = vmax.f32 %v2892_v13, 0.0  ;;  %v2820_v0 = vadd.f32 %v2819_v30, %v2791_v19 }
 0x45b   : > { %v2851_v25 = vpop.f32.mrf.mxu1 }
 0x45c   : > { %2908 = vst.msk [vmem:[%s4862_s18 + $0x10] sm:$0xff] %vm912_vm3, %v2900_v16  ;;  %v2849_v52 = vadd.f32 %v2848_v15, %v2820_v0 }
 0x45e   : > { %v2878_v42 = vadd.f32 %v2877_v63, %v2849_v52 }
 0x460   : > { %v2893_v38 = vadd.f32 %v2878_v42, %v4078_v27  ;;  %v2800_v11 = vpop.f32.mrf.mxu2 }
 0x461   : > { %v2822_v6 = vpop.f32.mrf.mxu3  ;;  %v2801_v57 = vadd.f32 %v2800_v11, %v2772_v36 }
 0x462   : > { %v2901_v8 = vmax.f32 %v2893_v38, 0.0  ;;  %v2823_v41 = vadd.f32 %v2822_v6, %v2794_v3 }
 0x463   : > { %v2853_v54 = vpop.f32.mrf.mxu1 }
 0x464   : > { %2909 = vst.msk [vmem:[%s4862_s18 + $0x18] sm:$0xff] %vm912_vm3, %v2901_v8  ;;  %v2852_v18 = vadd.f32 %v2851_v25, %v2823_v41 }
 0x466   : > { %v2881_v50 = vadd.f32 %v2880_v40, %v2852_v18 }
 0x468   : > { %v2894_v60 = vadd.f32 %v2881_v50, %v4105_v17 }
 0x469   : > { %v2824_v59 = vpop.f32.mrf.mxu3 }
 0x46a   : > { %v2902_v27 = vmax.f32 %v2894_v60, 0.0  ;;  %v2825_v10 = vadd.f32 %v2824_v59, %v2796_v29 }
 0x46b   : > { %v2856_v7 = vpop.f32.mrf.mxu1 }
 0x46c   : > { %2910 = vst.msk [vmem:[%s4862_s18 + $0x20] sm:$0xff] %vm912_vm3, %v2902_v27  ;;  %v2854_v24 = vadd.f32 %v2853_v54, %v2825_v10 }
 0x46e   : > { %v2883_v34 = vadd.f32 %v2882_v45, %v2854_v24 }
 0x470   : > { %v2895_v62 = vadd.f32 %v2883_v34, %v4155_v37 }
 0x471   : > { %v2827_v12 = vpop.f32.mrf.mxu3 }
 0x472   : > { %v2903_v17 = vmax.f32 %v2895_v62, 0.0  ;;  %v2828_v61 = vadd.f32 %v2827_v12, %v2799_v5 }
 0x473   : > { %v2858_v51 = vpop.f32.mrf.mxu1 }
 0x474   : > { %2911 = vst.msk [vmem:[%s4862_s18 + $0x28] sm:$0xff] %vm912_vm3, %v2903_v17  ;;  %v2857_v23 = vadd.f32 %v2856_v7, %v2828_v61 }
 0x476   : > { %v2886_v56 = vadd.f32 %v2885_v9, %v2857_v23 }
 0x478   : > { %v2896_v55 = vadd.f32 %v2886_v56, %v4146_v26 }
 0x479   : > { %v2829_v37 = vpop.f32.mrf.mxu3 }
 0x47a   : > { %v2904_v47 = vmax.f32 %v2896_v55, 0.0  ;;  %v2830_v53 = vadd.f32 %v2829_v37, %v2801_v57 }
 0x47c   : > { %2912 = vst.msk [vmem:[%s4862_s18 + $0x30] sm:$0xff] %vm912_vm3, %v2904_v47  ;;  %v2859_v39 = vadd.f32 %v2858_v51, %v2830_v53 }
 0x47e   : > { %v2888_v2 = vadd.f32 %v2887_v44, %v2859_v39 }
 0x480   : > { %v2897_v26 = vadd.f32 %v2888_v2, %v4188_v28 }
 0x482   : > { %v2905_v46 = vmax.f32 %v2897_v26, 0.0 }
 0x484   : > { %2913 = vst.msk [vmem:[%s4862_s18 + $0x38] sm:$0xff] %vm912_vm3, %v2905_v46 }
 0x485   : > { %3677 = shalt.err (!%p3674_p3)
}
 0x486   : > { %s3717_s17 = smov 128   ;;  %s3718_s18 = smov 8  }
 0x487   : > { %3603 = dma.vmem_to_hbm [thread:$0]  (%p3797_p5), %s2928_s23, 1024, %s2930_s29, %s2915_s28, %s3717_s17, %s3717_s17, %s3718_s18  }
 0x488 PF: > { %p3609_p4 = scmp.ge.s32.totalorder %s3712_s27, 2  ;;  %s2944_s20 = sand.u32 1, %s3700_s24  }
 0x489   : > { %s2945_s21 = scalar_lea.sflag [#allocation4], %s2944_s20 }
 0x48a   : > { %p3606_p7 = pnand %p3609_p4, %p3801_p6 }
 0x48c   : > { %p3607_p8 = pneg %p3606_p7 }
 0x48e   : > { %3695 = dma.done.wait (%p3607_p8), %s2945_s21, 1024  }
 0x48f   : > { %3697 = vsyncadd (%p3607_p8), %s2945_s21, 4294966272  ;;  %p17_p9 = scmp.ge.s32.totalorder %s3784_s30, 4   ;;  %s4940_s24 = smov %s3704_s25 }
 0x490   : > { %s4941_s25 = smov %s3708_s26  ;;  %s4942_s26 = smov %s3795_s10 }
 0x491   : > { %s4943_s27 = smov %s3784_s30  ;;  %19 = sbr.rel (!%p17_p9) target bundleno = 3 (0x3), region = 85 }
 0x496   :  { %2951 = vsyncpa [#allocation4], 1 }
 0x497   :  { %2953 = vsyncpa [#allocation4 + $0x1], 1 }

</bundles_post_ra>
